<compile_context>
chip_gen: v7x
topology: tpu7x:2x2x1
jax: 0.10.0
libtpu: 0.0.40
codegen_flags: <defaults>
</compile_context>

<pallas_src>
import jax
import jax.numpy as jnp
from jax.experimental import pallas as pl
from jax.experimental.pallas import tpu as pltpu


_INV_SQRT2 = 0.7071067811865476


def _erf(x):
    # Abramowitz & Stegun 7.1.26 rational approximation (|err| < 1.5e-7).
    # Uses only ops guaranteed to lower in Mosaic (exp / mul / add / select),
    # so the kernel does not depend on a lax.erf lowering rule.
    a1, a2, a3, a4, a5 = (0.254829592, -0.284496736, 1.421413741,
                          -1.453152027, 1.061405429)
    p = 0.3275911
    ax = jnp.abs(x)
    t = 1.0 / (1.0 + p * ax)
    poly = ((((a5 * t + a4) * t + a3) * t + a2) * t + a1) * t
    y = 1.0 - poly * jnp.exp(-ax * ax)
    return jnp.where(x >= 0, y, -y)


def _gelu_exact(x):
    # Matches torch.nn.GELU() (erf-based "exact" GELU) to ~1e-7.
    return 0.5 * x * (1.0 + _erf(x * _INV_SQRT2))


def _mlp_kernel(x_ref, w1_ref, b1_ref, w2_ref, b2_ref, out_ref):
    # x_ref  : (tm, C)        one row per spatial position (channels last)
    # w1_ref : (C, Hpad)      fc1 weight (1x1 conv == per-pixel linear)
    # b1_ref : (1, Hpad)      fc1 bias (f32)
    # w2_ref : (Hpad, Cpad)   fc2 weight
    # b2_ref : (1, Cpad)      fc2 bias (f32)
    # out_ref: (tm, Cpad)
    h = jnp.dot(x_ref[...], w1_ref[...], preferred_element_type=jnp.float32)
    h = _gelu_exact(h + b1_ref[...])
    o = jnp.dot(h.astype(w2_ref.dtype), w2_ref[...],
                preferred_element_type=jnp.float32)
    out_ref[...] = (o + b2_ref[...]).astype(out_ref.dtype)


def _round_up(n, m):
    return ((n + m - 1) // m) * m


def mlp_forward(x, w1, b1, w2, b2, *, block_m=256):
    """PoolFormer Mlp: fc1(1x1 conv) -> GELU -> fc2(1x1 conv).

    x : (B, C, H, W) NCHW (PyTorch layout)
    w1: (hidden, C, 1, 1),  b1: (hidden,)
    w2: (C_out, hidden, 1, 1), b2: (C_out,)
    returns (B, C_out, H, W)
    """
    B, C, H, W = x.shape
    hidden = w1.shape[0]
    c_out = w2.shape[0]
    assert w1.shape[1] == C and w2.shape[1] == hidden

    M = B * H * W
    # 1x1 conv == channel matmul at every pixel; go NCHW -> (M, C) channels-last.
    # (This staging transpose is the remaining extra HBM copy; it fuses with the
    #  surrounding XLA graph under jit.)
    x2d = jnp.transpose(x, (0, 2, 3, 1)).reshape(M, C)

    # Lane-dense padding of the feature axes (multiples of 128).
    h_pad = _round_up(hidden, 128)
    c_pad = _round_up(c_out, 128)

    w1_2d = jnp.transpose(w1.reshape(hidden, C))        # (C, hidden)
    w2_2d = jnp.transpose(w2.reshape(c_out, hidden))    # (hidden, c_out)
    w1_p = jnp.zeros((C, h_pad), w1.dtype).at[:, :hidden].set(w1_2d)
    w2_p = jnp.zeros((h_pad, c_pad), w2.dtype).at[:hidden, :c_out].set(w2_2d)
    b1_p = jnp.zeros((1, h_pad), jnp.float32).at[0, :hidden].set(
        b1.astype(jnp.float32))
    b2_p = jnp.zeros((1, c_pad), jnp.float32).at[0, :c_out].set(
        b2.astype(jnp.float32))

    tm = min(block_m, M)
    grid = (pl.cdiv(M, tm),)

    itemsize = jnp.dtype(x.dtype).itemsize
    cost = pl.CostEstimate(
        flops=2 * M * (C * h_pad + h_pad * c_pad),
        transcendentals=M * h_pad,
        bytes_accessed=(M * C + M * c_pad) * itemsize
        + (C * h_pad + h_pad * c_pad) * itemsize
        + (h_pad + c_pad) * 4,
    )

    out = pl.pallas_call(
        _mlp_kernel,
        out_shape=jax.ShapeDtypeStruct((M, c_pad), x.dtype),
        grid_spec=pltpu.PrefetchScalarGridSpec(
            num_scalar_prefetch=0,
            grid=grid,
            in_specs=[
                pl.BlockSpec((tm, C), lambda i: (i, 0)),       # pixels, tiled on M
                pl.BlockSpec((C, h_pad), lambda i: (0, 0)),    # weights stay resident
                pl.BlockSpec((1, h_pad), lambda i: (0, 0)),
                pl.BlockSpec((h_pad, c_pad), lambda i: (0, 0)),
                pl.BlockSpec((1, c_pad), lambda i: (0, 0)),
            ],
            out_specs=pl.BlockSpec((tm, c_pad), lambda i: (i, 0)),
        ),
        compiler_params=pltpu.CompilerParams(
            # M tiles are independent -> megacore sharding on v7x.
            dimension_semantics=("parallel",),
        ),
        cost_estimate=cost,
    )(x2d, w1_p, b1_p, w2_p, b2_p)

    out = out[:, :c_out].reshape(B, H, W, c_out)
    return jnp.transpose(out, (0, 3, 1, 2))


def reference_forward(x, w1, b1, w2, b2):
    h = jax.lax.conv_general_dilated(
        x.astype(jnp.float32), w1.astype(jnp.float32), (1, 1), "VALID",
        dimension_numbers=("NCHW", "OIHW", "NCHW"),
    ) + b1.reshape(1, -1, 1, 1).astype(jnp.float32)
    h = jax.nn.gelu(h, approximate=False)
    o = jax.lax.conv_general_dilated(
        h, w2.astype(jnp.float32), (1, 1), "VALID",
        dimension_numbers=("NCHW", "OIHW", "NCHW"),
    ) + b2.reshape(1, -1, 1, 1).astype(jnp.float32)
    return o


if __name__ == "__main__":
    # Small, module-consistent shapes: B=2, in_features=32, H=W=16,
    # hidden_features=128 (mlp_ratio=4), out_features=32.
    B, C, Hs, Ws = 2, 32, 16, 16
    hidden = 128
    c_out = 32

    key = jax.random.PRNGKey(0)
    kx, k1, k2, kb1, kb2 = jax.random.split(key, 5)
    x = jax.random.normal(kx, (B, C, Hs, Ws), dtype=jnp.float32)
    # Conv2d(C, hidden, 1) / Conv2d(hidden, c_out, 1) params (std~0.02 like
    # trunc_normal_; non-zero biases so the bias path is numerically exercised).
    w1 = jax.random.normal(k1, (hidden, C, 1, 1), dtype=jnp.float32) * 0.02
    w2 = jax.random.normal(k2, (c_out, hidden, 1, 1), dtype=jnp.float32) * 0.02
    b1 = jax.random.normal(kb1, (hidden,), dtype=jnp.float32) * 0.02
    b2 = jax.random.normal(kb2, (c_out,), dtype=jnp.float32) * 0.02

    y = jax.jit(mlp_forward)(x, w1, b1, w2, b2)
    y = jax.block_until_ready(y)

    y_ref = reference_forward(x, w1, b1, w2, b2)
    assert y.shape == (B, c_out, Hs, Ws), y.shape
    max_err = float(jnp.max(jnp.abs(y - y_ref)))
    assert jnp.allclose(y, y_ref, atol=1e-4, rtol=1e-4), max_err

    print("KERNEL_OK")
</pallas_src>

<mosaic_0001>
module attributes {stable_mosaic.version = 11 : i64} {
  func.func @_mlp_kernel(%arg0: i32, %arg1: memref<256x32xf32, #tpu.memory_space<vmem>>, %arg2: memref<32x128xf32, #tpu.memory_space<vmem>>, %arg3: memref<1x128xf32, #tpu.memory_space<vmem>>, %arg4: memref<128x128xf32, #tpu.memory_space<vmem>>, %arg5: memref<1x128xf32, #tpu.memory_space<vmem>>, %arg6: memref<256x128xf32, #tpu.memory_space<vmem>>) attributes {dimension_semantics = [#tpu.dimension_semantics<parallel>], iteration_bounds = array<i64: 2>, scalar_prefetch = 0 : i64, scratch_operands = 0 : i64, tpu.core_type = #tpu.core_type<tc>, window_params = [{transform_indices = @transform_0, window_bounds = array<i64: 256, 32>}, {pipeline_mode = #tpu.pipeline_mode<synchronous>, transform_indices = @transform_1, window_bounds = array<i64: 32, 128>}, {pipeline_mode = #tpu.pipeline_mode<synchronous>, transform_indices = @transform_2, window_bounds = array<i64: 1, 128>}, {pipeline_mode = #tpu.pipeline_mode<synchronous>, transform_indices = @transform_3, window_bounds = array<i64: 128, 128>}, {pipeline_mode = #tpu.pipeline_mode<synchronous>, transform_indices = @transform_4, window_bounds = array<i64: 1, 128>}, {transform_indices = @transform_5, window_bounds = array<i64: 256, 128>}]} {
    %c0 = arith.constant 0 : index
    %c0_0 = arith.constant 0 : index
    %0 = vector.load %arg1[%c0, %c0_0] : memref<256x32xf32, #tpu.memory_space<vmem>>, vector<256x32xf32>
    %c0_1 = arith.constant 0 : index
    %c0_2 = arith.constant 0 : index
    %1 = vector.load %arg2[%c0_1, %c0_2] : memref<32x128xf32, #tpu.memory_space<vmem>>, vector<32x128xf32>
    %cst = arith.constant dense<0.000000e+00> : vector<256x128xf32>
    %2 = tpu.matmul %0, %1, %cst {dimension_numbers = #tpu.dot_dimension_numbers<[1], [0], [0], [1], [0, 0, 1, 1], [], []>} : vector<256x32xf32>, vector<32x128xf32>, vector<256x128xf32> -> vector<256x128xf32>
    %c0_3 = arith.constant 0 : index
    %c0_4 = arith.constant 0 : index
    %3 = vector.load %arg3[%c0_3, %c0_4] : memref<1x128xf32, #tpu.memory_space<vmem>>, vector<1x128xf32>
    %4 = vector.broadcast %3 : vector<1x128xf32> to vector<256x128xf32>
    %5 = arith.addf %2, %4 : vector<256x128xf32>
    %cst_5 = arith.constant 5.000000e-01 : f32
    %6 = vector.broadcast %cst_5 : f32 to vector<256x128xf32>
    %7 = arith.mulf %6, %5 : vector<256x128xf32>
    %cst_6 = arith.constant 0.707106769 : f32
    %8 = vector.broadcast %cst_6 : f32 to vector<256x128xf32>
    %9 = arith.mulf %5, %8 : vector<256x128xf32>
    %10 = math.absf %9 : vector<256x128xf32>
    %cst_7 = arith.constant 0.327591091 : f32
    %11 = vector.broadcast %cst_7 : f32 to vector<256x128xf32>
    %12 = arith.mulf %11, %10 : vector<256x128xf32>
    %cst_8 = arith.constant 1.000000e+00 : f32
    %13 = vector.broadcast %cst_8 : f32 to vector<256x128xf32>
    %14 = arith.addf %13, %12 : vector<256x128xf32>
    %cst_9 = arith.constant 1.000000e+00 : f32
    %15 = vector.broadcast %cst_9 : f32 to vector<256x128xf32>
    %16 = arith.divf %15, %14 : vector<256x128xf32>
    %cst_10 = arith.constant 1.06140542 : f32
    %17 = vector.broadcast %cst_10 : f32 to vector<256x128xf32>
    %18 = arith.mulf %17, %16 : vector<256x128xf32>
    %cst_11 = arith.constant -1.45315206 : f32
    %19 = vector.broadcast %cst_11 : f32 to vector<256x128xf32>
    %20 = arith.addf %18, %19 : vector<256x128xf32>
    %21 = arith.mulf %20, %16 : vector<256x128xf32>
    %cst_12 = arith.constant 1.42141378 : f32
    %22 = vector.broadcast %cst_12 : f32 to vector<256x128xf32>
    %23 = arith.addf %21, %22 : vector<256x128xf32>
    %24 = arith.mulf %23, %16 : vector<256x128xf32>
    %cst_13 = arith.constant -0.284496725 : f32
    %25 = vector.broadcast %cst_13 : f32 to vector<256x128xf32>
    %26 = arith.addf %24, %25 : vector<256x128xf32>
    %27 = arith.mulf %26, %16 : vector<256x128xf32>
    %cst_14 = arith.constant 0.254829586 : f32
    %28 = vector.broadcast %cst_14 : f32 to vector<256x128xf32>
    %29 = arith.addf %27, %28 : vector<256x128xf32>
    %30 = arith.mulf %29, %16 : vector<256x128xf32>
    %cst_15 = arith.constant 0.000000e+00 : f32
    %31 = vector.broadcast %cst_15 : f32 to vector<256x128xf32>
    %32 = arith.subf %31, %10 : vector<256x128xf32>
    %33 = arith.mulf %32, %10 : vector<256x128xf32>
    %34 = math.exp %33 : vector<256x128xf32>
    %35 = arith.mulf %30, %34 : vector<256x128xf32>
    %cst_16 = arith.constant 1.000000e+00 : f32
    %36 = vector.broadcast %cst_16 : f32 to vector<256x128xf32>
    %37 = arith.subf %36, %35 : vector<256x128xf32>
    %cst_17 = arith.constant 0.000000e+00 : f32
    %38 = vector.broadcast %cst_17 : f32 to vector<256x128xf32>
    %39 = arith.cmpf oge, %9, %38 : vector<256x128xf32>
    %cst_18 = arith.constant 0.000000e+00 : f32
    %40 = vector.broadcast %cst_18 : f32 to vector<256x128xf32>
    %41 = arith.subf %40, %37 : vector<256x128xf32>
    %42 = arith.select %39, %37, %41 : vector<256x128xi1>, vector<256x128xf32>
    %cst_19 = arith.constant 1.000000e+00 : f32
    %43 = vector.broadcast %cst_19 : f32 to vector<256x128xf32>
    %44 = arith.addf %43, %42 : vector<256x128xf32>
    %45 = arith.mulf %7, %44 : vector<256x128xf32>
    %c0_20 = arith.constant 0 : index
    %c0_21 = arith.constant 0 : index
    %46 = vector.load %arg4[%c0_20, %c0_21] : memref<128x128xf32, #tpu.memory_space<vmem>>, vector<128x128xf32>
    %cst_22 = arith.constant dense<0.000000e+00> : vector<256x128xf32>
    %47 = tpu.matmul %45, %46, %cst_22 {dimension_numbers = #tpu.dot_dimension_numbers<[1], [0], [0], [1], [0, 0, 1, 1], [], []>} : vector<256x128xf32>, vector<128x128xf32>, vector<256x128xf32> -> vector<256x128xf32>
    %c0_23 = arith.constant 0 : index
    %c0_24 = arith.constant 0 : index
    %48 = vector.load %arg5[%c0_23, %c0_24] : memref<1x128xf32, #tpu.memory_space<vmem>>, vector<1x128xf32>
    %49 = vector.broadcast %48 : vector<1x128xf32> to vector<256x128xf32>
    %50 = arith.addf %47, %49 : vector<256x128xf32>
    %c0_25 = arith.constant 0 : index
    %c0_26 = arith.constant 0 : index
    %51 = vector.load %arg6[%c0_25, %c0_26] : memref<256x128xf32, #tpu.memory_space<vmem>>, vector<256x128xf32>
    tpu.vector_store %arg6[%c0_25, %c0_26], %50 {strides = array<i32>} : memref<256x128xf32, #tpu.memory_space<vmem>>, vector<256x128xf32>,
    return
  }
  func.func @transform_0(%arg0: i32) -> (i32, i32) {
    %c0_i32 = arith.constant 0 : i32
    %c0_i32_0 = arith.constant 0 : i32
    return %arg0, %c0_i32 : i32, i32
  }
  func.func @transform_1(%arg0: i32) -> (i32, i32) {
    %c0_i32 = arith.constant 0 : i32
    %c0_i32_0 = arith.constant 0 : i32
    %c0_i32_1 = arith.constant 0 : i32
    return %c0_i32, %c0_i32_0 : i32, i32
  }
  func.func @transform_2(%arg0: i32) -> (i32, i32) {
    %c0_i32 = arith.constant 0 : i32
    %c0_i32_0 = arith.constant 0 : i32
    %c0_i32_1 = arith.constant 0 : i32
    return %c0_i32, %c0_i32_0 : i32, i32
  }
  func.func @transform_3(%arg0: i32) -> (i32, i32) {
    %c0_i32 = arith.constant 0 : i32
    %c0_i32_0 = arith.constant 0 : i32
    %c0_i32_1 = arith.constant 0 : i32
    return %c0_i32, %c0_i32_0 : i32, i32
  }
  func.func @transform_4(%arg0: i32) -> (i32, i32) {
    %c0_i32 = arith.constant 0 : i32
    %c0_i32_0 = arith.constant 0 : i32
    %c0_i32_1 = arith.constant 0 : i32
    return %c0_i32, %c0_i32_0 : i32, i32
  }
  func.func @transform_5(%arg0: i32) -> (i32, i32) {
    %c0_i32 = arith.constant 0 : i32
    %c0_i32_0 = arith.constant 0 : i32
    return %arg0, %c0_i32 : i32, i32
  }
}

</mosaic_0001>

<bundles_post_ra>
// kernel: mlp_forward.1
= control target key start
LH: loop header
LB: loop body
LE: loop exit
PB: predicated region body
PF: predicated region fallthrough
CT: control target
= control target key end

     0   :  { %10 = vsyncpa [#allocation3], 0  ;;  %s3507_s0 = inlined_call_operand.vmem [shape: f32[512,32], index: 0, kind: input, shape index: {}]   ;;  %s3508_s1 = inlined_call_operand.vmem [shape: f32[32,128], index: 1, kind: input, shape index: {}]   ;;  %s3509_s2 = inlined_call_operand.vmem [shape: f32[1,128], index: 2, kind: input, shape index: {}]   ;;  %s3510_s3 = inlined_call_operand.vmem [shape: f32[128,128], index: 3, kind: input, shape index: {}]   ;;  %s3511_s4 = inlined_call_operand.vmem [shape: f32[1,128], index: 4, kind: input, shape index: {}]   ;;  %s3512_s5 = inlined_call_operand.hbm [shape: f32[512,128], index: 5, kind: output, shape index: {}]  }
   0x1   :  { %12 = vsyncpa [#allocation3 + $0x1], 0  ;;  %s2400_s18 = smov 0   ;;  %s2402_s19 = smov 0  }
   0x2   :  { %s2404_s20 = smov 0   ;;  %s2406_s21 = smov 0  }
   0x3 LB: > { %s2421_s22 = sadd.s32 4294967295, %s2365_s21   ;;  %s1811_s23 = sadd.s32 4294967294, %s2365_s21   ;;  %s2365_s21 = sphi %s2406_s21, %s3721_s21   ;;  %s2361_s20 = sphi %s2404_s20, %s3720_s20   ;;  %s2357_s19 = sphi %s2402_s19, %s3719_s19   ;;  %s2353_s18 = sphi %s2400_s18, %s3718_s18  }
   0x4   : > { %s2425_s24 = sadd.s32 1, %s2365_s21   ;;  %s135_s25 = sadd.s32 1, %s2361_s20 }
   0x5   : > { %s132_s26 = ssub.s32 %s2365_s21, %s2425_s24  ;;  %p145_p0 = scmp.ne.s32.totalorder %s2361_s20, %s2357_s19 }
   0x6   : > { %p133_p1 = scmp.eq.s32.totalorder %s132_s26, 0  ;;  %p146_p2 = scmp.eq.s32.totalorder %s2421_s22, 1 }
   0x7   : > { %p151_p3 = scmp.ne.s32.totalorder %s2357_s19, %s2353_s18  ;;  %p152_p4 = scmp.eq.s32.totalorder %s1811_s23, 1 }
   0x8   : > { %s2436_s27 = scalar_select %p133_p1, %s2361_s20, %s135_s25  }
   0x9   : > { %p2438_p5 = por %p146_p2, %p145_p0  ;;  %p2442_p6 = por %p152_p4, %p151_p3 }
   0xa   : > { %p1814_p7 = scmp.ge.s32.totalorder %s2365_s21, 1  ;;  %p191_p8 = scmp.lt.s32.totalorder %s2365_s21, 3 }
   0xc   : > { %p192_p9 = pnand %p1814_p7, %p191_p8 }
   0xe   : > { %195 = sbr.rel (%p192_p9) target bundleno = 705 (0x2c1), region = 40 }
  0x15   : > { %v258_v0 = vld [vmem:[%s3508_s1] sm:$0xff]  ;;  %v259_v1 = vld [vmem:[%s3508_s1 + $0x8] sm:$0xff]  ;;  %v260_v2 = vld [vmem:[%s3508_s1 + $0x10] sm:$0xff]  ;;  %s1816_s11 = sshll.u32 %s2421_s22, 5  ;;  %vm269_vm0 = vcmask 261120   ;;  %s216_s26 = sand.u32 1, %s2357_s19  }
  0x16   : > { %v2078_v3 = vpack.c.bf16 %v259_v1, %v258_v0  ;;  %v261_v4 = vld [vmem:[%s3508_s1 + $0x18] sm:$0xff]  ;;  %p220_p10 = scmp.lt.s32.totalorder %s1816_s11, 63  ;;  %v1455_v38 = vld [vmem:[%s3510_s3] sm:$0xff]  ;;  %v1456_v39 = vld [vmem:[%s3510_s3 + $0x8] sm:$0xff]  ;;  %s1815_s30 = sshll.u32 %s216_s26, 8 }
  0x17   : > { %v2082_v5 = vpack.c.bf16 %v261_v4, %v260_v2  ;;  %v2086_v40 = vpack.c.bf16 %v1456_v39, %v1455_v38  ;;  %v1457_v41 = vld [vmem:[%s3510_s3 + $0x10] sm:$0xff]  ;;  %v1458_v42 = vld [vmem:[%s3510_s3 + $0x18] sm:$0xff]  ;;  %v1459_v44 = vld [vmem:[%s3510_s3 + $0x20] sm:$0xff]  ;;  %s3391_s8 = scalar_lea.vmem [#allocation2], %s1815_s30  ;;  %s1857_s9 = sshll.u32 %s2421_s22, 12 }
  0x18   : > { %2079 = vmatprep.subr.bf16.mxu0 %v2078_v3  ;;  %s3723_s11 = smov (!%p220_p10, %s1816_s11), 63  ;;  %v2090_v43 = vpack.c.bf16 %v1458_v42, %v1457_v41  ;;  %v1460_v45 = vld [vmem:[%s3510_s3 + $0x28] sm:$0xff]  ;;  %v1461_v47 = vld [vmem:[%s3510_s3 + $0x30] sm:$0xff]  ;;  %v1462_v48 = vld [vmem:[%s3510_s3 + $0x38] sm:$0xff]  ;;  %s1749_s10 = sshll.u32 %s3391_s8, 4  ;;  %s3459_s10 = int_to_ptr.vmem [resolvable:$true] %s1749_s10 }
  0x19   : > { %2081 = vmatpush3.bf16.msra.mxu0 %v2078_v3  ;;  %s1817_s14 = sshll.u32 %s3723_s11, 3  ;;  %2118 = vmatprep.subr.bf16.mxu1 %v2086_v40  ;;  %v2094_v46 = vpack.c.bf16 %v1460_v45, %v1459_v44  ;;  %v2098_v49 = vpack.c.bf16 %v1462_v48, %v1461_v47  ;;  %v1463_v50 = vld [vmem:[%s3510_s3 + $0x40] sm:$0xff]  ;;  %v1464_v51 = vld [vmem:[%s3510_s3 + $0x48] sm:$0xff]  ;;  %v1465_v53 = vld [vmem:[%s3510_s3 + $0x50] sm:$0xff]  ;;  %s3457_s13 = scalar_lea.hbm %s3512_s5, %s1857_s9 }
  0x1a   : > { %2083 = vmatprep.subr.bf16.mxu0 %v2082_v5  ;;  %s2464_s17 = scalar_lea.vmem %s3507_s0, %s1817_s14  ;;  %2126 = vmatpush3.bf16.msra.mxu1 %v2086_v40  ;;  %v2102_v52 = vpack.c.bf16 %v1464_v51, %v1463_v50  ;;  %v1466_v54 = vld [vmem:[%s3510_s3 + $0x58] sm:$0xff]  ;;  %v1467_v56 = vld [vmem:[%s3510_s3 + $0x60] sm:$0xff]  ;;  %v1468_v57 = vld [vmem:[%s3510_s3 + $0x68] sm:$0xff]  ;;  %s3466_s22 = scalar_lea.sflag [#allocation3], %s216_s26 }
  0x1b   : > { %v226_v6 = vld [vmem:[%s2464_s17] sm:$0xff]  ;;  %v227_v7 = vld [vmem:[%s2464_s17 + $0x8] sm:$0xff]  ;;  %v228_v8 = vld [vmem:[%s2464_s17 + $0x10] sm:$0xff]  ;;  %2119 = vmatprep.subr.bf16.mxu1 %v2090_v43  ;;  %v2106_v55 = vpack.c.bf16 %v1466_v54, %v1465_v53  ;;  %v2110_v58 = vpack.c.bf16 %v1468_v57, %v1467_v56  ;;  %s2303_s14 = scalar_lea.vmem %s3459_s10, 4096  ;;  %s2367_s15 = smov [#allocation2]  }
  0x1c   : > { %1950 = vmatprep.mubr.msk.f32.mxu0 %vm269_vm0, %v226_v6  ;;  %v229_v9 = vld [vmem:[%s2464_s17 + $0x18] sm:$0xff]  ;;  %v230_v10 = vld [vmem:[%s2464_s17 + $0x20] sm:$0xff]  ;;  %v231_v11 = vld [vmem:[%s2464_s17 + $0x28] sm:$0xff]  ;;  %p2304_p11 = scmp.ne.s32.totalorder %s3459_s10, %s2303_s14  ;;  %s2307_s16 = sshll.u32 %s2367_s15, 4  ;;  %s2308_s16 = int_to_ptr.vmem [resolvable:$false] %s2307_s16 }
  0x1d   : > { %2085 = vmatpush3.bf16.msra.mxu0 %v2082_v5  ;;  %v232_v12 = vld [vmem:[%s2464_s17 + $0x30] sm:$0xff]  ;;  %v233_v13 = vld [vmem:[%s2464_s17 + $0x38] sm:$0xff]  ;;  %v234_v14 = vld [vmem:[%s2464_s17 + $0x40] sm:$0xff]  ;;  %p2310_p0 = scmp.lt.s32.totalorder %s3459_s10, %s2308_s16 }
  0x1e   : > { %v235_v15 = vld [vmem:[%s2464_s17 + $0x48] sm:$0xff]  ;;  %v236_v16 = vld [vmem:[%s2464_s17 + $0x50] sm:$0xff]  ;;  %v237_v17 = vld [vmem:[%s2464_s17 + $0x58] sm:$0xff]  ;;  %2087 = vmatprep.subr.bf16.mxu0 %v2086_v40  ;;  %2127 = vmatpush3.bf16.msra.mxu1 %v2090_v43  ;;  %p2305_p12 = pnand %p2304_p11, %p2438_p5 }
  0x1f   : > { %v238_v18 = vld [vmem:[%s2464_s17 + $0x60] sm:$0xff]  ;;  %v239_v19 = vld [vmem:[%s2464_s17 + $0x68] sm:$0xff]  ;;  %v240_v20 = vld [vmem:[%s2464_s17 + $0x70] sm:$0xff]  ;;  %2120 = vmatprep.subr.bf16.mxu1 %v2094_v46 }
  0x20   : > { %1951 = vmatmul.mubr.msk.f32.vlgmr.msra.gmra.mrb[0].mxu0 %vm269_vm0, %v227_v7  ;;  %v241_v21 = vld [vmem:[%s2464_s17 + $0x78] sm:$0xff]  ;;  %v242_v22 = vld [vmem:[%s2464_s17 + $0x80] sm:$0xff]  ;;  %v243_v23 = vld [vmem:[%s2464_s17 + $0x88] sm:$0xff]  ;;  %p2306_p13 = pneg %p2305_p12 }
  0x21   : > { %1953 = vmatprep.mubr.msk.f32.mxu0 %vm269_vm0, %v228_v8  ;;  %v244_v24 = vld [vmem:[%s2464_s17 + $0x90] sm:$0xff]  ;;  %v245_v25 = vld [vmem:[%s2464_s17 + $0x98] sm:$0xff]  ;;  %v246_v26 = vld [vmem:[%s2464_s17 + $0xa0] sm:$0xff]  ;;  %2089 = vmatpush3.bf16.msra.mxu0 %v2086_v40 }
  0x22   : > { %v247_v27 = vld [vmem:[%s2464_s17 + $0xa8] sm:$0xff]  ;;  %v248_v28 = vld [vmem:[%s2464_s17 + $0xb0] sm:$0xff]  ;;  %v249_v29 = vld [vmem:[%s2464_s17 + $0xb8] sm:$0xff]  ;;  %2091 = vmatprep.subr.bf16.mxu0 %v2090_v43  ;;  %2128 = vmatpush3.bf16.msra.mxu1 %v2094_v46 }
  0x23   : > { %v250_v30 = vld [vmem:[%s2464_s17 + $0xc0] sm:$0xff]  ;;  %v251_v31 = vld [vmem:[%s2464_s17 + $0xc8] sm:$0xff]  ;;  %v252_v32 = vld [vmem:[%s2464_s17 + $0xd0] sm:$0xff]  ;;  %2121 = vmatprep.subr.bf16.mxu1 %v2098_v49 }
  0x24   : > { %1954 = vmatmul.mubr.msk.f32.gmra.mrb[2].mxu0 %vm269_vm0, %v229_v9  ;;  %v253_v33 = vld [vmem:[%s2464_s17 + $0xd8] sm:$0xff]  ;;  %v254_v34 = vld [vmem:[%s2464_s17 + $0xe0] sm:$0xff]  ;;  %v255_v35 = vld [vmem:[%s2464_s17 + $0xe8] sm:$0xff] }
  0x25   : > { %1956 = vmatprep.mubr.msk.f32.mxu0 %vm269_vm0, %v230_v10  ;;  %v256_v36 = vld [vmem:[%s2464_s17 + $0xf0] sm:$0xff]  ;;  %v257_v37 = vld [vmem:[%s2464_s17 + $0xf8] sm:$0xff]  ;;  %2093 = vmatpush3.bf16.msra.mxu0 %v2090_v43  ;;  %v2581_v62 = vld [vmem:[%s3509_s2] ss:$0 sm:$0xff]  ;;  %s2309_s17 = scalar_lea.vmem %s2308_s16, 8192 }
  0x26   : > { %2095 = vmatprep.subr.bf16.mxu0 %v2094_v46  ;;  %2129 = vmatpush3.bf16.msra.mxu1 %v2098_v49  ;;  %v1469_v59 = vld [vmem:[%s3510_s3 + $0x70] sm:$0xff]  ;;  %v1470_v60 = vld [vmem:[%s3510_s3 + $0x78] sm:$0xff]  ;;  %p2311_p1 = scmp.lt.s32.totalorder %s2309_s17, %s2303_s14 }
  0x27   : > { %2122 = vmatprep.subr.bf16.mxu1 %v2102_v52  ;;  %v2114_v61 = vpack.c.bf16 %v1470_v60, %v1469_v59 }
  0x28   : > { %1957 = vmatmul.mubr.msk.f32.gmra.mrb[4].mxu0 %vm269_vm0, %v231_v11  ;;  %p2312_p2 = por %p2311_p1, %p2310_p0 }
  0x29   : > { %1959 = vmatprep.mubr.msk.f32.mxu0 %vm269_vm0, %v232_v12  ;;  %2097 = vmatpush3.bf16.msra.mxu0 %v2094_v46 }
  0x2a   : > { %2099 = vmatprep.subr.bf16.mxu0 %v2098_v49  ;;  %2130 = vmatpush3.bf16.msra.mxu1 %v2102_v52  ;;  %p2313_p3 = pnand %p2312_p2, %p2306_p13 }
  0x2b   : > { %2123 = vmatprep.subr.bf16.mxu1 %v2106_v55 }
  0x2c   : > { %1960 = vmatmul.mubr.msk.f32.gmra.mrb[6].mxu0 %vm269_vm0, %v233_v13 }
  0x2d   : > { %1962 = vmatprep.mubr.msk.f32.mxu0 %vm269_vm0, %v234_v14  ;;  %2101 = vmatpush3.bf16.msra.mxu0 %v2098_v49 }
  0x2e   : > { %2103 = vmatprep.subr.bf16.mxu0 %v2102_v52  ;;  %2131 = vmatpush3.bf16.msra.mxu1 %v2106_v55 }
  0x2f   : > { %2124 = vmatprep.subr.bf16.mxu1 %v2110_v58 }
  0x30   : > { %1963 = vmatmul.mubr.msk.f32.gmra.mrb[8].mxu0 %vm269_vm0, %v235_v15 }
  0x31   : > { %1965 = vmatprep.mubr.msk.f32.mxu0 %vm269_vm0, %v236_v16  ;;  %2105 = vmatpush3.bf16.msra.mxu0 %v2102_v52 }
  0x32   : > { %2107 = vmatprep.subr.bf16.mxu0 %v2106_v55  ;;  %2132 = vmatpush3.bf16.msra.mxu1 %v2110_v58 }
  0x33   : > { %2125 = vmatprep.subr.bf16.mxu1 %v2114_v61 }
  0x34   : > { %1966 = vmatmul.mubr.msk.f32.gmra.mrb[10].mxu0 %vm269_vm0, %v237_v17 }
  0x35   : > { %1968 = vmatprep.mubr.msk.f32.mxu0 %vm269_vm0, %v238_v18  ;;  %2109 = vmatpush3.bf16.msra.mxu0 %v2106_v55 }
  0x36   : > { %2111 = vmatprep.subr.bf16.mxu0 %v2110_v58  ;;  %2133 = vmatpush3.bf16.msra.mxu1 %v2114_v61 }
  0x38   : > { %1969 = vmatmul.mubr.msk.f32.gmra.mrb[12].mxu0 %vm269_vm0, %v239_v19 }
  0x39   : > { %1971 = vmatprep.mubr.msk.f32.mxu0 %vm269_vm0, %v240_v20  ;;  %2113 = vmatpush3.bf16.msra.mxu0 %v2110_v58 }
  0x3a   : > { %2115 = vmatprep.subr.bf16.mxu0 %v2114_v61 }
  0x3c   : > { %1972 = vmatmul.mubr.msk.f32.gmra.mrb[14].mxu0 %vm269_vm0, %v241_v21 }
  0x3d   : > { %1974 = vmatprep.mubr.msk.f32.mxu0 %vm269_vm0, %v242_v22  ;;  %2117 = vmatpush3.bf16.msra.mxu0 %v2114_v61 }
  0x40   : > { %1975 = vmatmul.mubr.msk.f32.gmra.mrb[16].mxu0 %vm269_vm0, %v243_v23 }
  0x41   : > { %1977 = vmatprep.mubr.msk.f32.mxu0 %vm269_vm0, %v244_v24 }
  0x44   : > { %1978 = vmatmul.mubr.msk.f32.gmra.mrb[18].mxu0 %vm269_vm0, %v245_v25 }
  0x45   : > { %1980 = vmatprep.mubr.msk.f32.mxu0 %vm269_vm0, %v246_v26 }
  0x48   : > { %1981 = vmatmul.mubr.msk.f32.gmra.mrb[20].mxu0 %vm269_vm0, %v247_v27 }
  0x49   : > { %1983 = vmatprep.mubr.msk.f32.mxu0 %vm269_vm0, %v248_v28 }
  0x4c   : > { %1984 = vmatmul.mubr.msk.f32.gmra.mrb[22].mxu0 %vm269_vm0, %v249_v29 }
  0x4d   : > { %1986 = vmatprep.mubr.msk.f32.mxu0 %vm269_vm0, %v250_v30 }
  0x50   : > { %1987 = vmatmul.mubr.msk.f32.gmra.mrb[24].mxu0 %vm269_vm0, %v251_v31 }
  0x51   : > { %1989 = vmatprep.mubr.msk.f32.mxu0 %vm269_vm0, %v252_v32 }
  0x54   : > { %1990 = vmatmul.mubr.msk.f32.gmra.mrb[26].mxu0 %vm269_vm0, %v253_v33 }
  0x55   : > { %1992 = vmatprep.mubr.msk.f32.mxu0 %vm269_vm0, %v254_v34 }
  0x58   : > { %1993 = vmatmul.mubr.msk.f32.gmra.mrb[28].mxu0 %vm269_vm0, %v255_v35 }
  0x59   : > { %1995 = vmatprep.mubr.msk.f32.mxu0 %vm269_vm0, %v256_v36 }
  0x5c   : > { %1996 = vmatmul.mubr.msk.f32.gmra.mrb[30].mxu0 %vm269_vm0, %v257_v37 }
  0xf3   : > { %v1952_v63 = vpop.f32.mrb[0].mxu0 }
  0xf4   : > { %v438_v0 = vadd.f32 %v1952_v63, %v2581_v62  ;;  %v432_v1 = vpop.f32.mrb[1].mxu0 }
  0xf5   : > { %v433_v5 = vadd.f32 %v2581_v62, %v432_v1 }
  0xf6   : > { %v2584_v2 = vmul.f32 0.70710677, %v438_v0  ;;  %v2611_v32 = vmul.f32 0.5, %v438_v0 }
  0xf7   : > { %v1955_v3 = vpop.f32.mrb[2].mxu0  ;;  %v2589_v10 = vmul.f32 0.70710677, %v433_v5  ;;  %v2624_v48 = vmul.f32 0.5, %v433_v5 }
  0xf8   : > { %v656_v4 = vand.u32 2147483647, %v2584_v2  ;;  %v442_v6 = vpop.f32.mrb[3].mxu0  ;;  %v448_v8 = vadd.f32 %v1955_v3, %v2581_v62  ;;  %vm1296_vm1 = vcmp.ge.f32.partialorder %v2584_v2, 0.0 }
  0xf9   : > { %v443_v14 = vadd.f32 %v2581_v62, %v442_v6  ;;  %v655_v17 = vand.u32 2147483647, %v2589_v10  ;;  %vm1295_vm2 = vcmp.ge.f32.partialorder %v2589_v10, 0.0 }
  0xfa   : > { %v688_v7 = vmul.f32 0.3275911, %v656_v4  ;;  %v2591_v13 = vmul.f32 0.70710677, %v448_v8  ;;  %v1104_v16 = vsub.f32 0.0, %v656_v4  ;;  %v2626_v49 = vmul.f32 0.5, %v448_v8 }
  0xfb   : > { %v1958_v11 = vpop.f32.mrb[4].mxu0  ;;  %v2599_v21 = vmul.f32 0.70710677, %v443_v14  ;;  %v687_v25 = vmul.f32 0.3275911, %v655_v17  ;;  %v1103_v26 = vsub.f32 0.0, %v655_v17 }
  0xfc   : > { %v720_v9 = vadd.f32 1.0, %v688_v7  ;;  %v452_v12 = vpop.f32.mrb[5].mxu0  ;;  %v2596_v19 = vadd.f32 %v1958_v11, %v2581_v62  ;;  %v658_v20 = vand.u32 2147483647, %v2591_v13  ;;  %v1136_v24 = vmul.f32 %v1104_v16, %v656_v4  ;;  %3573 = vst [vmem:[#allocation6_spill] sm:$0xff] %v2626_v49 }
  0xfd   : > { %v2602_v22 = vadd.f32 %v2581_v62, %v452_v12  ;;  %v657_v30 = vand.u32 2147483647, %v2599_v21  ;;  %v719_v36 = vadd.f32 1.0, %v687_v25  ;;  %v1135_v37 = vmul.f32 %v1103_v26, %v655_v17 }
  0xfe   : > { %2175 = vrcp.f32 %v720_v9  ;;  %v2605_v28 = vmul.f32 0.70710677, %v2596_v19  ;;  %v1106_v29 = vsub.f32 0.0, %v658_v20  ;;  %v1169_v35 = vmul.f32 1.442695, %v1136_v24 }
  0xff   : > { %v1961_v15 = vpop.f32.mrb[6].mxu0  ;;  %v2609_v31 = vmul.f32 0.70710677, %v2602_v22  ;;  %v690_v41 = vmul.f32 0.3275911, %v658_v20  ;;  %v1105_v44 = vsub.f32 0.0, %v657_v30  ;;  %2177 = vrcp.f32 %v719_v36 }
 0x100   : > { %v462_v18 = vpop.f32.mrb[7].mxu0  ;;  %3572 = vst [vmem:[#allocation5_spill] sm:$0xff] %v2605_v28  ;;  %v2616_v38 = vadd.f32 %v1961_v15, %v2581_v62  ;;  %v660_v42 = vand.u32 2147483647, %v2605_v28  ;;  %v1138_v43 = vmul.f32 %v1106_v29, %v658_v20  ;;  %v689_v50 = vmul.f32 0.3275911, %v657_v30 }
 0x101   : > { %v659_v45 = vand.u32 2147483647, %v2609_v31  ;;  %v2622_v46 = vadd.f32 %v2581_v62, %v462_v18  ;;  %v1167_v51 = vmul.f32 1.442695, %v1135_v37  ;;  %2179 = vpow2.f32 %v1169_v35 }
 0x102   : > { %v2629_v52 = vmul.f32 0.70710677, %v2616_v38  ;;  %v722_v56 = vadd.f32 1.0, %v690_v41  ;;  %v1108_v57 = vsub.f32 0.0, %v660_v42  ;;  %v1173_v59 = vmul.f32 1.442695, %v1138_v43 }
 0x103   : > { %v1964_v23 = vpop.f32.mrb[8].mxu0  ;;  %v1137_v60 = vmul.f32 %v1105_v44, %v657_v30  ;;  %v1107_v61 = vsub.f32 0.0, %v659_v45  ;;  %v2638_v63 = vmul.f32 0.70710677, %v2622_v46  ;;  %v721_v1 = vadd.f32 1.0, %v689_v50 }
 0x104   : > { %v472_v27 = vpop.f32.mrb[9].mxu0  ;;  %3574 = vst [vmem:[#allocation7_spill] sm:$0xff] %v2629_v52  ;;  %v2632_v53 = vadd.f32 %v1964_v23, %v2581_v62  ;;  %v692_v3 = vmul.f32 0.3275911, %v660_v42  ;;  %2181 = vpow2.f32 %v1167_v51  ;;  %v2645_v6 = vmul.f32 0.5, %v443_v14 }
 0x105   : > { %3575 = vst [vmem:[#allocation8_spill] sm:$0xff] %v2638_v63  ;;  %v2641_v4 = vadd.f32 %v2581_v62, %v472_v27  ;;  %v662_v7 = vand.u32 2147483647, %v2629_v52  ;;  %v1140_v12 = vmul.f32 %v1108_v57, %v660_v42  ;;  %v691_v15 = vmul.f32 0.3275911, %v659_v45 }
 0x106   : > { %v2649_v8 = vmul.f32 0.70710677, %v2632_v53  ;;  %2183 = vrcp.f32 %v722_v56  ;;  %v1171_v17 = vmul.f32 1.442695, %v1137_v60  ;;  %v1139_v18 = vmul.f32 %v1107_v61, %v659_v45 }
 0x107   : > { %v1967_v33 = vpop.f32.mrb[10].mxu0  ;;  %v661_v14 = vand.u32 2147483647, %v2638_v63  ;;  %2185 = vrcp.f32 %v721_v1  ;;  %v2659_v23 = vmul.f32 0.5, %v2596_v19  ;;  %v2662_v24 = vmul.f32 0.70710677, %v2641_v4 }
 0x108   : > { %v2613_v34 = vpop.eup %2175  ;;  %v482_v39 = vpop.f32.mrb[11].mxu0  ;;  %3576 = vst [vmem:[#allocation9_spill] sm:$0xff] %v2649_v8  ;;  %v2655_v16 = vadd.f32 %v1967_v33, %v2581_v62  ;;  %2187 = vpow2.f32 %v1173_v59  ;;  %v724_v26 = vadd.f32 1.0, %v692_v3  ;;  %v1110_v27 = vsub.f32 0.0, %v662_v7 }
 0x109   : > { %v816_v40 = vmul.f32 1.0614054, %v2613_v34  ;;  %3577 = vst [vmem:[#allocation10_spill] sm:$0xff] %v2659_v23  ;;  %3578 = vst [vmem:[#allocation11_spill] sm:$0xff] %v2662_v24  ;;  %v664_v29 = vand.u32 2147483647, %v2649_v8  ;;  %v2673_v19 = vpop.eup %2177  ;;  %v2676_v43 = vadd.f32 %v2581_v62, %v482_v39  ;;  %2189 = vpow2.f32 %v1171_v17 }
 0x10a   : > { %v1177_v35 = vmul.f32 1.442695, %v1140_v12  ;;  %v723_v36 = vadd.f32 1.0, %v691_v15  ;;  %v2671_v37 = vmul.f32 0.70710677, %v2655_v16  ;;  %v1109_v42 = vsub.f32 0.0, %v661_v14 }
 0x10b   : > { %v848_v47 = vadd.f32 -1.4531521, %v816_v40  ;;  %v1970_v54 = vpop.f32.mrb[12].mxu0  ;;  %v1175_v40 = vmul.f32 1.442695, %v1139_v18  ;;  %v2180_v44 = vpop.eup %2179  ;;  %v2679_v45 = vmul.f32 0.5, %v2602_v22  ;;  %2191 = vrcp.f32 %v724_v26 }
 0x10c   : > { %v2635_v58 = vpop.f32.mrb[13].mxu0  ;;  %3579 = vst [vmem:[#allocation12_spill] sm:$0xff] %v2671_v37  ;;  %v694_v41 = vmul.f32 0.3275911, %v662_v7  ;;  %v663_v50 = vand.u32 2147483647, %v2662_v24  ;;  %v2685_v57 = vadd.f32 %v1970_v54, %v2581_v62  ;;  %2193 = vrcp.f32 %v723_v36 }
 0x10d   : > { %v880_v55 = vmul.f32 %v2613_v34, %v848_v47  ;;  %3580 = vst [vmem:[#allocation13_spill] sm:$0xff] %v2679_v45  ;;  %v693_v47 = vmul.f32 0.3275911, %v661_v14  ;;  %v1112_v56 = vsub.f32 0.0, %v664_v29  ;;  %v2690_v60 = vmul.f32 0.5, %v2616_v38 }
 0x10e   : > { %v666_v22 = vand.u32 2147483647, %v2671_v37  ;;  %v2693_v61 = vpop.eup %2181  ;;  %2195 = vpow2.f32 %v1177_v35  ;;  %v1141_v1 = vmul.f32 %v1109_v42, %v661_v14  ;;  %v2696_v3 = vmul.f32 0.70710677, %v2676_v43 }
 0x10f   : > { %v912_v0 = vadd.f32 1.4214138, %v880_v55  ;;  %v2643_v5 = vpop.f32.mrb[14].mxu0  ;;  %v1142_v55 = vmul.f32 %v1110_v27, %v662_v7  ;;  %3581 = vst [vmem:[#allocation14_spill] sm:$0xff] %v2690_v60  ;;  %2197 = vpow2.f32 %v1175_v40  ;;  %v725_v54 = vadd.f32 1.0, %v693_v47 }
 0x110   : > { %v2651_v9 = vpop.f32.mrb[15].mxu0  ;;  %3582 = vst [vmem:[#allocation15_spill] sm:$0xff] %v2696_v3  ;;  %v696_v7 = vmul.f32 0.3275911, %v664_v29  ;;  %v2700_v15 = vpop.eup %2183  ;;  %v1144_v17 = vmul.f32 %v1112_v56, %v664_v29  ;;  %v2703_v18 = vmul.f32 0.70710677, %v2685_v57  ;;  %v2716_v36 = vadd.f32 %v2643_v5, %v2581_v62 }
 0x111   : > { %v944_v11 = vmul.f32 %v2613_v34, %v912_v0  ;;  %v726_v0 = vadd.f32 1.0, %v694_v41  ;;  %v1181_v38 = vmul.f32 1.442695, %v1142_v55  ;;  %v2711_v26 = vpop.eup %2185  ;;  %v1114_v35 = vsub.f32 0.0, %v666_v22 }
 0x112   : > { %3583 = vst [vmem:[#allocation16_spill] sm:$0xff] %v2703_v18  ;;  %v2718_v29 = vpop.eup %2187  ;;  %v1179_v40 = vmul.f32 1.442695, %v1141_v1  ;;  %v665_v41 = vand.u32 2147483647, %v2696_v3  ;;  %v728_v42 = vadd.f32 1.0, %v696_v7 }
 0x113   : > { %v976_v20 = vadd.f32 -0.28449672, %v944_v11  ;;  %v2664_v25 = vpop.f32.mrb[16].mxu0  ;;  %v1111_v11 = vsub.f32 0.0, %v663_v50  ;;  %2199 = vrcp.f32 %v726_v0  ;;  %v698_v55 = vmul.f32 0.3275911, %v666_v22  ;;  %v2731_v0 = vpop.eup %2189 }
 0x114   : > { %v2667_v30 = vpop.f32.mrb[17].mxu0  ;;  %2201 = vrcp.f32 %v725_v54  ;;  %v1185_v56 = vmul.f32 1.442695, %v1144_v17  ;;  %v668_v5 = vand.u32 2147483647, %v2703_v18  ;;  %v1146_v37 = vmul.f32 %v1114_v35, %v666_v22 }
 0x115   : > { %v1008_v33 = vmul.f32 %v2613_v34, %v976_v20  ;;  %v2707_v20 = vadd.f32 %v2581_v62, %v2635_v58  ;;  %v1143_v47 = vmul.f32 %v1111_v11, %v663_v50  ;;  %2203 = vpow2.f32 %v1181_v38  ;;  %v2740_v7 = vpop.eup %2191 }
 0x116   : > { %v2736_v54 = vmul.f32 0.70710677, %v2716_v36  ;;  %2205 = vpow2.f32 %v1179_v40  ;;  %v2743_v11 = vmul.f32 0.5, %v2632_v53  ;;  %v1113_v38 = vsub.f32 0.0, %v665_v41  ;;  %v2746_v17 = vpop.eup %2193 }
 0x117   : > { %v2682_v51 = vpop.f32.mrb[18].mxu0  ;;  %v1040_v39 = vadd.f32 0.2548296, %v1008_v33  ;;  %v695_v33 = vmul.f32 0.3275911, %v663_v50  ;;  %2207 = vrcp.f32 %v728_v42  ;;  %v1116_v35 = vsub.f32 0.0, %v668_v5 }
 0x118   : > { %v2687_v59 = vpop.f32.mrb[19].mxu0  ;;  %v2722_v58 = vmul.f32 0.70710677, %v2707_v20  ;;  %3585 = vst [vmem:[#allocation18_spill] sm:$0xff] %v2736_v54  ;;  %3586 = vst [vmem:[#allocation19_spill] sm:$0xff] %v2743_v11  ;;  %2209 = vpow2.f32 %v1185_v56  ;;  %v2761_v42 = vmul.f32 0.5, %v2641_v4  ;;  %v1145_v56 = vmul.f32 %v1113_v38, %v665_v41 }
 0x119   : > { %v1072_v27 = vmul.f32 %v2613_v34, %v1040_v39  ;;  %v2729_v39 = vadd.f32 %v2581_v62, %v2651_v9  ;;  %v727_v60 = vadd.f32 1.0, %v695_v33  ;;  %v697_v22 = vmul.f32 0.3275911, %v665_v41  ;;  %v2748_v33 = vpop.eup %2195 }
 0x11a   : > { %3584 = vst [vmem:[#allocation17_spill] sm:$0xff] %v2722_v58  ;;  %v667_v9 = vand.u32 2147483647, %v2722_v58  ;;  %3587 = vst [vmem:[#allocation20_spill] sm:$0xff] %v2748_v33  ;;  %v670_v18 = vand.u32 2147483647, %v2736_v54  ;;  %v2756_v11 = vpop.eup %2197  ;;  %v2767_v23 = vadd.f32 %v2664_v25, %v2581_v62  ;;  %v2771_v3 = vadd.f32 %v2581_v62, %v2667_v30 }
 0x11b   : > { %v2698_v12 = vpop.f32.mrb[20].mxu0  ;;  %v2733_v1 = vmul.f32 %v2180_v44, %v1072_v27  ;;  %v1183_v44 = vmul.f32 1.442695, %v1143_v47  ;;  %v730_v27 = vadd.f32 1.0, %v698_v55  ;;  %v2752_v40 = vmul.f32 0.70710677, %v2729_v39 }
 0x11c   : > { %v2709_v14 = vpop.f32.mrb[21].mxu0  ;;  %3589 = vst [vmem:[#allocation22_spill] sm:$0xff] %v2761_v42  ;;  %2211 = vrcp.f32 %v727_v60  ;;  %v1189_v47 = vmul.f32 1.442695, %v1146_v37  ;;  %v1115_v54 = vsub.f32 0.0, %v667_v9  ;;  %v729_v4 = vadd.f32 1.0, %v697_v22 }
 0x11d   : > { %3588 = vst [vmem:[#allocation21_spill] sm:$0xff] %v2752_v40  ;;  %v1264_v58 = vsub.f32 1.0, %v2733_v1  ;;  %v2774_v1 = vmul.f32 0.5, %v2655_v16  ;;  %2213 = vrcp.f32 %v730_v27  ;;  %v700_v42 = vmul.f32 0.3275911, %v668_v5  ;;  %v2778_v37 = vpop.eup %2199 }
 0x11e   : > { %2215 = vpow2.f32 %v1183_v44  ;;  %v1148_v41 = vmul.f32 %v1116_v35, %v668_v5  ;;  %v1118_v38 = vsub.f32 0.0, %v670_v18  ;;  %v669_v25 = vand.u32 2147483647, %v2752_v40  ;;  %v2781_v24 = vpop.eup %2201 }
 0x11f   : > { %v2724_v34 = vpop.f32.mrb[22].mxu0  ;;  %3590 = vst [vmem:[#allocation23_spill] sm:$0xff] %v2774_v1  ;;  %2217 = vpow2.f32 %v1189_v47  ;;  %v2784_v30 = vmul.f32 0.5, %v2676_v43  ;;  %v2787_v16 = vmul.f32 0.70710677, %v2767_v23  ;;  %v2794_v1 = vpop.eup %2203  ;;  %v1328_v5 = vsub.f32 0.0, %v1264_v58 }
 0x120   : > { %v2738_v50 = vpop.f32.mrb[23].mxu0  ;;  %v2790_v27 = vmul.f32 0.70710677, %v2771_v3  ;;  %3594 = vst [vmem:[#allocation27_spill] sm:$0xff] %v2794_v1  ;;  %v1187_v44 = vmul.f32 1.442695, %v1145_v56  ;;  %v1147_v40 = vmul.f32 %v1115_v54, %v667_v9  ;;  %2219 = vrcp.f32 %v729_v4  ;;  %v2804_v63 = vpop.eup %2205 }
 0x121   : > { %3591 = vst [vmem:[#allocation24_spill] sm:$0xff] %v2784_v30  ;;  %3592 = vst [vmem:[#allocation25_spill] sm:$0xff] %v2787_v16  ;;  %v699_v35 = vmul.f32 0.3275911, %v667_v9  ;;  %v2797_v47 = vmul.f32 0.5, %v2685_v57  ;;  %v732_v43 = vadd.f32 1.0, %v700_v42  ;;  %v1150_v45 = vmul.f32 %v1118_v38, %v670_v18  ;;  %v2808_v56 = vpop.eup %2207 }
 0x122   : > { %3593 = vst [vmem:[#allocation26_spill] sm:$0xff] %v2790_v27  ;;  %v2800_v30 = vmul.f32 0.5, %v2707_v20  ;;  %3597 = vst [vmem:[#allocation30_spill] sm:$0xff] %v2804_v63  ;;  %v1193_v52 = vmul.f32 1.442695, %v1148_v41  ;;  %v1117_v1 = vsub.f32 0.0, %v669_v25  ;;  %v2814_v20 = vadd.f32 %v2682_v51, %v2581_v62  ;;  %v2820_v42 = vpop.eup %2209 }
 0x123   : > { %v2754_v53 = vpop.f32.mrb[24].mxu0  ;;  %3595 = vst [vmem:[#allocation28_spill] sm:$0xff] %v2797_v47  ;;  %v702_v33 = vmul.f32 0.3275911, %v670_v18  ;;  %v672_v54 = vand.u32 2147483647, %v2787_v16  ;;  %v2818_v9 = vadd.f32 %v2581_v62, %v2687_v59  ;;  %v1360_v18 = vsel %vm1296_vm1, %v1264_v58, %v1328_v5 }
 0x124   : > { %v2763_v55 = vpop.f32.mrb[25].mxu0  ;;  %3596 = vst [vmem:[#allocation29_spill] sm:$0xff] %v2800_v30  ;;  %v671_v57 = vand.u32 2147483647, %v2790_v27  ;;  %3598 = vst [vmem:[#allocation31_spill] sm:$0xff] %v2820_v42  ;;  %2221 = vpow2.f32 %v1187_v44  ;;  %v731_v4 = vadd.f32 1.0, %v699_v35  ;;  %v2831_v51 = vadd.f32 %v2698_v12, %v2581_v62 }
 0x125   : > { %v1191_v41 = vmul.f32 1.442695, %v1147_v40  ;;  %2223 = vrcp.f32 %v732_v43  ;;  %v701_v47 = vmul.f32 0.3275911, %v669_v25  ;;  %v2827_v16 = vmul.f32 0.70710677, %v2814_v20 }
 0x126   : > { %v2824_v38 = vpop.eup %2211  ;;  %2225 = vpow2.f32 %v1193_v52  ;;  %v734_v27 = vadd.f32 1.0, %v702_v33  ;;  %v1149_v2 = vmul.f32 %v1117_v1, %v669_v25  ;;  %v2836_v58 = vmul.f32 0.70710677, %v2818_v9 }
 0x127   : > { %v2776_v60 = vpop.f32.mrb[26].mxu0  ;;  %3599 = vst [vmem:[#allocation32_spill] sm:$0xff] %v2827_v16  ;;  %v2840_v5 = vpop.eup %2213  ;;  %v1197_v44 = vmul.f32 1.442695, %v1150_v45  ;;  %v704_v35 = vmul.f32 0.3275911, %v672_v54  ;;  %2227 = vrcp.f32 %v731_v4 }
 0x128   : > { %v2792_v22 = vpop.f32.mrb[27].mxu0  ;;  %3600 = vst [vmem:[#allocation33_spill] sm:$0xff] %v2836_v58  ;;  %3601 = vst [vmem:[#allocation34_spill] sm:$0xff] %v2840_v5  ;;  %v1120_v43 = vsub.f32 0.0, %v672_v54  ;;  %v1119_v30 = vsub.f32 0.0, %v671_v57  ;;  %v2842_v42 = vpop.eup %2215  ;;  %v1392_v12 = vadd.f32 1.0, %v1360_v18  ;;  %2229 = vpow2.f32 %v1191_v41 }
 0x129   : > { %v2845_v63 = vmul.f32 0.5, %v2716_v36  ;;  %v674_v52 = vand.u32 2147483647, %v2827_v16  ;;  %v2848_v33 = vpop.eup %2217  ;;  %v733_v1 = vadd.f32 1.0, %v701_v47  ;;  %v703_v25 = vmul.f32 0.3275911, %v671_v57 }
 0x12a   : > { %3603 = vst [vmem:[#allocation36_spill] sm:$0xff] %v2848_v33  ;;  %v2851_v5 = vmul.f32 0.70710677, %v2831_v51  ;;  %2231 = vrcp.f32 %v734_v27  ;;  %v1195_v45 = vmul.f32 1.442695, %v1149_v2  ;;  %v2856_v18 = vadd.f32 %v2581_v62, %v2709_v14  ;;  %v2858_v36 = vpop.eup %2219 }
 0x12b   : > { %v2802_v8 = vpop.f32.mrb[28].mxu0  ;;  %3602 = vst [vmem:[#allocation35_spill] sm:$0xff] %v2845_v63  ;;  %v673_v49 = vand.u32 2147483647, %v2836_v58  ;;  %2233 = vpow2.f32 %v1197_v44  ;;  %v736_v4 = vadd.f32 1.0, %v704_v35  ;;  %v1152_v63 = vmul.f32 %v1120_v43, %v672_v54 }
 0x12c   : > { %v2806_v28 = vpop.f32.mrb[29].mxu0  ;;  %3604 = vst [vmem:[#allocation37_spill] sm:$0xff] %v2851_v5  ;;  %v1151_v16 = vmul.f32 %v1119_v30, %v671_v57  ;;  %v1122_v41 = vsub.f32 0.0, %v674_v52  ;;  %v676_v47 = vand.u32 2147483647, %v2851_v5  ;;  %v2866_v27 = vadd.f32 %v2724_v34, %v2581_v62 }
 0x12d   : > { %v2862_v33 = vmul.f32 0.70710677, %v2856_v18  ;;  %v2869_v2 = vmul.f32 %v1392_v12, %v2611_v32  ;;  %v2872_v14 = vmul.f32 0.5, %v2729_v39  ;;  %2235 = vrcp.f32 %v733_v1 }
 0x12e   : > { %v735_v44 = vadd.f32 1.0, %v703_v25  ;;  %v2874_v54 = vpop.eup %2221  ;;  %2237 = vpow2.f32 %v1195_v45  ;;  %v706_v30 = vmul.f32 0.3275911, %v674_v52  ;;  %v1121_v57 = vsub.f32 0.0, %v673_v49 }
 0x12f   : > { %v2833_v59 = vpop.f32.mrb[30].mxu0  ;;  %3605 = vst [vmem:[#allocation38_spill] sm:$0xff] %v2862_v33  ;;  %3606 = vst [vmem:[#allocation39_spill] sm:$0xff] %v2872_v14  ;;  %v675_v35 = vand.u32 2147483647, %v2862_v33  ;;  %v2877_v43 = vpop.eup %2223  ;;  %v2880_v34 = vmul.f32 0.5, %v2767_v23  ;;  %2239 = vrcp.f32 %v736_v4  ;;  %v1154_v1 = vmul.f32 %v1122_v41, %v674_v52 }
 0x130   : > { %v2838_v40 = vpop.f32.mrb[31].mxu0  ;;  %3607 = vst [vmem:[#allocation40_spill] sm:$0xff] %v2877_v43  ;;  %v1201_v32 = vmul.f32 1.442695, %v1152_v63  ;;  %v705_v12 = vmul.f32 0.3275911, %v673_v49  ;;  %v2882_v5 = vpop.eup %2225  ;;  %2241 = vrcp.f32 %v735_v44  ;;  %v2892_v33 = vadd.f32 %v2581_v62, %v2738_v50 }
 0x131   : > { %3608 = vst [vmem:[#allocation41_spill] sm:$0xff] %v2880_v34  ;;  %3609 = vst [vmem:[#allocation42_spill] sm:$0xff] %v2882_v5  ;;  %v1199_v39 = vmul.f32 1.442695, %v1151_v16  ;;  %v1124_v25 = vsub.f32 0.0, %v676_v47  ;;  %v2888_v45 = vmul.f32 0.5, %v2771_v3  ;;  %v2896_v63 = vadd.f32 %v2754_v53, %v2581_v62  ;;  %v2898_v23 = vpop.eup %2227 }
 0x132   : > { %v2885_v14 = vmul.f32 0.70710677, %v2866_v27  ;;  %v738_v16 = vadd.f32 1.0, %v706_v30  ;;  %v1153_v52 = vmul.f32 %v1121_v57, %v673_v49  ;;  %v1123_v4 = vsub.f32 0.0, %v675_v35  ;;  %v2901_v34 = vpop.eup %2229 }
 0x133   : > { %3611 = vst [vmem:[#allocation44_spill] sm:$0xff] %v2888_v45  ;;  %3612 = vst [vmem:[#allocation45_spill] sm:$0xff] %v2901_v34  ;;  %2243 = vpow2.f32 %v1201_v32  ;;  %v737_v3 = vadd.f32 1.0, %v705_v12  ;;  %v708_v44 = vmul.f32 0.3275911, %v676_v47  ;;  %v1156_v58 = vmul.f32 %v1124_v25, %v676_v47 }
 0x134   : > { %3610 = vst [vmem:[#allocation43_spill] sm:$0xff] %v2885_v14  ;;  %v678_v41 = vand.u32 2147483647, %v2885_v14  ;;  %v2904_v45 = vmul.f32 0.70710677, %v2892_v33  ;;  %v2906_v50 = vpop.eup %2231  ;;  %2245 = vpow2.f32 %v1199_v39  ;;  %v2916_v32 = vadd.f32 %v2581_v62, %v2763_v55 }
 0x135   : > { %3614 = vst [vmem:[#allocation47_spill] sm:$0xff] %v2906_v50  ;;  %v1205_v53 = vmul.f32 1.442695, %v1154_v1  ;;  %v2908_v43 = vpop.eup %2233  ;;  %v707_v49 = vmul.f32 0.3275911, %v675_v35  ;;  %v2919_v12 = vmul.f32 0.5, %v2814_v20  ;;  %2247 = vrcp.f32 %v738_v16 }
 0x136   : > { %3613 = vst [vmem:[#allocation46_spill] sm:$0xff] %v2904_v45  ;;  %v1126_v5 = vsub.f32 0.0, %v678_v41  ;;  %3615 = vst [vmem:[#allocation48_spill] sm:$0xff] %v2908_v43  ;;  %v677_v30 = vand.u32 2147483647, %v2904_v45  ;;  %v1155_v1 = vmul.f32 %v1123_v4, %v675_v35  ;;  %2249 = vrcp.f32 %v737_v3 }
 0x137   : > { %v2912_v57 = vmul.f32 0.70710677, %v2896_v63  ;;  %3617 = vst [vmem:[#allocation50_spill] sm:$0xff] %v2919_v12  ;;  %v1203_v39 = vmul.f32 1.442695, %v1153_v52  ;;  %v2921_v47 = vpop.eup %2235  ;;  %v740_v25 = vadd.f32 1.0, %v708_v44  ;;  %v2931_v20 = vadd.f32 %v2776_v60, %v2581_v62 }
 0x138   : > { %v710_v14 = vmul.f32 0.3275911, %v678_v41  ;;  %v2924_v43 = vpop.eup %2237  ;;  %v1209_v34 = vmul.f32 1.442695, %v1156_v58  ;;  %v1158_v50 = vmul.f32 %v1126_v5, %v678_v41  ;;  %v2927_v55 = vmul.f32 0.70710677, %v2916_v32 }
 0x139   : > { %3616 = vst [vmem:[#allocation49_spill] sm:$0xff] %v2912_v57  ;;  %v680_v45 = vand.u32 2147483647, %v2912_v57  ;;  %3619 = vst [vmem:[#allocation52_spill] sm:$0xff] %v2931_v20  ;;  %v2933_v16 = vpop.eup %2239  ;;  %2251 = vpow2.f32 %v1205_v53  ;;  %v2936_v35 = vmul.f32 0.5, %v2818_v9  ;;  %v739_v52 = vadd.f32 1.0, %v707_v49 }
 0x13a   : > { %3618 = vst [vmem:[#allocation51_spill] sm:$0xff] %v2927_v55  ;;  %v1125_v4 = vsub.f32 0.0, %v677_v30  ;;  %2253 = vpow2.f32 %v1203_v39  ;;  %v2939_v3 = vmul.f32 0.5, %v2831_v51  ;;  %v2942_v58 = vmul.f32 0.5, %v2856_v18  ;;  %v2944_v41 = vpop.eup %2241 }
 0x13b   : > { %3620 = vst [vmem:[#allocation53_spill] sm:$0xff] %v2936_v35  ;;  %v1207_v5 = vmul.f32 1.442695, %v1155_v1  ;;  %2255 = vrcp.f32 %v740_v25  ;;  %v742_v60 = vadd.f32 1.0, %v710_v14  ;;  %v1128_v44 = vsub.f32 0.0, %v680_v45 }
 0x13c   : > { %3621 = vst [vmem:[#allocation54_spill] sm:$0xff] %v2939_v3  ;;  %3622 = vst [vmem:[#allocation55_spill] sm:$0xff] %v2942_v58  ;;  %v679_v53 = vand.u32 2147483647, %v2927_v55  ;;  %2257 = vpow2.f32 %v1209_v34  ;;  %v1213_v9 = vmul.f32 1.442695, %v1158_v50  ;;  %v1157_v51 = vmul.f32 %v1125_v4, %v677_v30 }
 0x13d   : > { %v709_v57 = vmul.f32 0.3275911, %v677_v30  ;;  %v2948_v49 = vmul.f32 0.70710677, %v2931_v20  ;;  %v2950_v39 = vpop.eup %2243  ;;  %2259 = vrcp.f32 %v739_v52  ;;  %v815_v18 = vmul.f32 1.0614054, %v2673_v19 }
 0x13e   : > { %3624 = vst [vmem:[#allocation57_spill] sm:$0xff] %v2950_v39  ;;  %v2955_v1 = vadd.f32 %v2581_v62, %v2792_v22  ;;  %v2957_v14 = vpop.eup %2245  ;;  %2261 = vpow2.f32 %v1207_v5  ;;  %v712_v25 = vmul.f32 0.3275911, %v680_v45  ;;  %v2962_v50 = vadd.f32 %v2802_v8, %v2581_v62 }
 0x13f   : > { %3623 = vst [vmem:[#allocation56_spill] sm:$0xff] %v2948_v49  ;;  %v682_v34 = vand.u32 2147483647, %v2948_v49  ;;  %2263 = vrcp.f32 %v742_v60  ;;  %v1160_v20 = vmul.f32 %v1128_v44, %v680_v45  ;;  %v1127_v52 = vsub.f32 0.0, %v679_v53  ;;  %v2964_v4 = vpop.eup %2247 }
 0x140   : > { %3625 = vst [vmem:[#allocation58_spill] sm:$0xff] %v2962_v50  ;;  %v847_v30 = vadd.f32 -1.4531521, %v815_v18  ;;  %v2967_v3 = vmul.f32 0.5, %v2866_v27  ;;  %2265 = vpow2.f32 %v1213_v9  ;;  %v2970_v22 = vmul.f32 0.5, %v2892_v33  ;;  %v2972_v55 = vpop.eup %2249 }
 0x141   : > { %v741_v5 = vadd.f32 1.0, %v709_v57  ;;  %v1211_v49 = vmul.f32 1.442695, %v1157_v51  ;;  %v711_v58 = vmul.f32 0.3275911, %v679_v53  ;;  %v744_v60 = vadd.f32 1.0, %v712_v25 }
 0x142   : > { %3626 = vst [vmem:[#allocation59_spill] sm:$0xff] %v2967_v3  ;;  %3627 = vst [vmem:[#allocation60_spill] sm:$0xff] %v2970_v22  ;;  %v879_v8 = vmul.f32 %v2673_v19, %v847_v30  ;;  %v2976_v45 = vmul.f32 0.70710677, %v2955_v1  ;;  %v1130_v44 = vsub.f32 0.0, %v682_v34  ;;  %v1159_v57 = vmul.f32 %v1127_v52, %v679_v53 }
 0x143   : > { %v2979_v18 = vmul.f32 0.70710677, %v2962_v50  ;;  %v817_v27 = vmul.f32 1.0614054, %v2711_v26  ;;  %v2982_v9 = vpop.eup %2251  ;;  %v1217_v33 = vmul.f32 1.442695, %v1160_v20  ;;  %2267 = vrcp.f32 %v741_v5 }
 0x144   : > { %3628 = vst [vmem:[#allocation61_spill] sm:$0xff] %v2976_v45  ;;  %3630 = vst [vmem:[#allocation63_spill] sm:$0xff] %v2982_v9  ;;  %v911_v3 = vadd.f32 1.4214138, %v879_v8  ;;  %v681_v51 = vand.u32 2147483647, %v2976_v45  ;;  %v2985_v22 = vpop.eup %2253  ;;  %2269 = vpow2.f32 %v1211_v49  ;;  %v2995_v20 = vadd.f32 %v2581_v62, %v2806_v28 }
 0x145   : > { %3629 = vst [vmem:[#allocation62_spill] sm:$0xff] %v2979_v18  ;;  %v2988_v30 = vmul.f32 0.5, %v2896_v63  ;;  %v714_v25 = vmul.f32 0.3275911, %v682_v34  ;;  %v849_v12 = vadd.f32 -1.4531521, %v817_v27  ;;  %v2990_v35 = vpop.eup %2255  ;;  %2271 = vrcp.f32 %v744_v60 }
 0x146   : > { %v743_v50 = vadd.f32 1.0, %v711_v58  ;;  %v943_v39 = vmul.f32 %v2673_v19, %v911_v3  ;;  %3632 = vst [vmem:[#allocation65_spill] sm:$0xff] %v2995_v20  ;;  %v2997_v53 = vpop.eup %2257  ;;  %v1162_v52 = vmul.f32 %v1130_v44, %v682_v34  ;;  %v684_v5 = vand.u32 2147483647, %v2979_v18 }
 0x147   : > { %3631 = vst [vmem:[#allocation64_spill] sm:$0xff] %v2988_v30  ;;  %3633 = vst [vmem:[#allocation66_spill] sm:$0xff] %v2997_v53  ;;  %v881_v63 = vmul.f32 %v2711_v26, %v849_v12  ;;  %v3001_v8 = vpop.eup %2259  ;;  %2273 = vpow2.f32 %v1217_v33  ;;  %v1215_v27 = vmul.f32 1.442695, %v1159_v57  ;;  %v713_v58 = vmul.f32 0.3275911, %v681_v51 }
 0x148   : > { %v975_v49 = vadd.f32 -0.28449672, %v943_v39  ;;  %v3003_v30 = vpop.eup %2261  ;;  %v746_v3 = vadd.f32 1.0, %v714_v25  ;;  %v1129_v45 = vsub.f32 0.0, %v681_v51  ;;  %v3006_v9 = vmul.f32 0.70710677, %v2995_v20 }
 0x149   : > { %v913_v28 = vadd.f32 1.4214138, %v881_v63  ;;  %v3008_v60 = vpop.eup %2263  ;;  %v3011_v34 = vmul.f32 0.5, %v2916_v32  ;;  %2275 = vrcp.f32 %v743_v50  ;;  %v818_v44 = vmul.f32 1.0614054, %v2700_v15 }
 0x14a   : > { %3634 = vst [vmem:[#allocation67_spill] sm:$0xff] %v3006_v9  ;;  %v1007_v12 = vmul.f32 %v2673_v19, %v975_v49  ;;  %v3015_v39 = vpop.eup %2265  ;;  %v1221_v33 = vmul.f32 1.442695, %v1162_v52  ;;  %v716_v57 = vmul.f32 0.3275911, %v684_v5  ;;  %v1132_v25 = vsub.f32 0.0, %v684_v5 }
 0x14b   : > { %3635 = vst [vmem:[#allocation68_spill] sm:$0xff] %v3011_v34  ;;  %3636 = vst [vmem:[#allocation69_spill] sm:$0xff] %v3015_v39  ;;  %v945_v63 = vmul.f32 %v2711_v26, %v913_v28  ;;  %2277 = vpow2.f32 %v1215_v27  ;;  %v683_v20 = vand.u32 2147483647, %v3006_v9  ;;  %v850_v53 = vadd.f32 -1.4531521, %v818_v44 }
 0x14c   : > { %v1039_v18 = vadd.f32 0.2548296, %v1007_v12  ;;  %2279 = vrcp.f32 %v746_v3  ;;  %v745_v32 = vadd.f32 1.0, %v713_v58  ;;  %v1161_v50 = vmul.f32 %v1129_v45, %v681_v51 }
 0x14d   : > { %v977_v49 = vadd.f32 -0.28449672, %v945_v63  ;;  %v882_v39 = vmul.f32 %v2700_v15, %v850_v53  ;;  %v3024_v52 = vadd.f32 %v2833_v59, %v2581_v62  ;;  %v819_v27 = vmul.f32 1.0614054, %v2746_v17  ;;  %v3027_v28 = vpop.eup %2267 }
 0x14e   : > { %v1071_v34 = vmul.f32 %v2673_v19, %v1039_v18  ;;  %2281 = vpow2.f32 %v1221_v33  ;;  %v748_v12 = vadd.f32 1.0, %v716_v57  ;;  %v1164_v44 = vmul.f32 %v1132_v25, %v684_v5  ;;  %v3030_v58 = vpop.eup %2269 }
 0x14f   : > { %3637 = vst [vmem:[#allocation70_spill] sm:$0xff] %v3024_v52  ;;  %v1009_v3 = vmul.f32 %v2711_v26, %v977_v49  ;;  %3638 = vst [vmem:[#allocation71_spill] sm:$0xff] %v3030_v58  ;;  %v1131_v19 = vsub.f32 0.0, %v683_v20  ;;  %v914_v18 = vadd.f32 1.4214138, %v882_v39  ;;  %v3036_v59 = vpop.eup %2271  ;;  %2283 = vrcp.f32 %v745_v32 }
 0x150   : > { %v1231_v45 = vmul.f32 %v2693_v61, %v1071_v34  ;;  %v3034_v51 = vmul.f32 0.70710677, %v3024_v52  ;;  %v1219_v53 = vmul.f32 1.442695, %v1161_v50  ;;  %v851_v9 = vadd.f32 -1.4531521, %v819_v27 }
 0x151   : > { %v1041_v63 = vadd.f32 0.2548296, %v1009_v3  ;;  %v3038_v33 = vpop.eup %2273  ;;  %vm1297_vm3 = vcmp.ge.f32.partialorder %v2599_v21, 0.0  ;;  %v946_v57 = vmul.f32 %v2700_v15, %v914_v18  ;;  %v3045_v34 = vadd.f32 %v2581_v62, %v2838_v40 }
 0x152   : > { %3639 = vst [vmem:[#allocation72_spill] sm:$0xff] %v3034_v51  ;;  %3640 = vst [vmem:[#allocation73_spill] sm:$0xff] %v3038_v33  ;;  %v1263_v5 = vsub.f32 1.0, %v1231_v45  ;;  %v686_v61 = vand.u32 2147483647, %v3034_v51  ;;  %2285 = vrcp.f32 %v748_v12  ;;  %v883_v32 = vmul.f32 %v2746_v17, %v851_v9 }
 0x153   : > { %3641 = vst [vmem:[#allocation74_spill] sm:$0xff] %v3045_v34  ;;  %v1073_v39 = vmul.f32 %v2711_v26, %v1041_v63  ;;  %v715_v25 = vmul.f32 0.3275911, %v683_v20  ;;  %v3049_v50 = vpop.eup %2275  ;;  %v1163_v27 = vmul.f32 %v1131_v19, %v683_v20  ;;  %v978_v3 = vadd.f32 -0.28449672, %v946_v57 }
 0x154   : > { %v1327_v49 = vsub.f32 0.0, %v1263_v5  ;;  %v718_v45 = vmul.f32 0.3275911, %v686_v61  ;;  %v1225_v52 = vmul.f32 1.442695, %v1164_v44  ;;  %v1134_v51 = vsub.f32 0.0, %v686_v61 }
 0x155   : > { %v1233_v18 = vmul.f32 %v2731_v0, %v1073_v39  ;;  %v915_v33 = vadd.f32 1.4214138, %v883_v32  ;;  %v3052_v58 = vpop.eup %2277  ;;  %v1010_v26 = vmul.f32 %v2700_v15, %v978_v3  ;;  %v3058_v40 = vmul.f32 0.70710677, %v3045_v34  ;;  %v3648_v34 = vld [vmem:[#allocation13_spill] sm:$0xff] }
 0x156   : > { %v1359_v62 = vsel %vm1295_vm2, %v1263_v5, %v1327_v49  ;;  %v820_v9 = vmul.f32 1.0614054, %v2740_v7  ;;  %v3061_v20 = vpop.eup %2279  ;;  %v747_v19 = vadd.f32 1.0, %v715_v25  ;;  %2287 = vpow2.f32 %v1219_v53 }
 0x157   : > { %3642 = vst [vmem:[#allocation75_spill] sm:$0xff] %v3058_v40  ;;  %v1391_v12 = vadd.f32 1.0, %v1359_v62  ;;  %v1265_v44 = vsub.f32 1.0, %v1233_v18  ;;  %v947_v0 = vmul.f32 %v2746_v17, %v915_v33  ;;  %v1223_v63 = vmul.f32 1.442695, %v1163_v27 }
 0x158   : > { %v1042_v57 = vadd.f32 0.2548296, %v1010_v26  ;;  %v750_v39 = vadd.f32 1.0, %v718_v45  ;;  %v3064_v10 = vpop.eup %2281  ;;  %vm1298_vm4 = vcmp.ge.f32.partialorder %v2591_v13, 0.0  ;;  %v1166_v49 = vmul.f32 %v1134_v51, %v686_v61 }
 0x159   : > { %v1423_v5 = vmul.f32 %v1391_v12, %v2624_v48  ;;  %v1329_v32 = vsub.f32 0.0, %v1265_v44  ;;  %v979_v3 = vadd.f32 -0.28449672, %v947_v0  ;;  %2289 = vpow2.f32 %v1225_v52  ;;  %v3072_v53 = vpop.eup %2283 }
 0x15a   : > { %v1074_v62 = vmul.f32 %v2700_v15, %v1042_v57  ;;  %v3070_v25 = vand.u32 2147483647, %v3058_v40  ;;  %v852_v33 = vadd.f32 -1.4531521, %v820_v9  ;;  %v3075_v27 = vmul.f32 0.5, %v2955_v1 }
 0x15b   : > { %2030 = vmatprep.mubr.f32.mxu0 %v1423_v5  ;;  %v1361_v45 = vsel %vm1297_vm3, %v1265_v44, %v1329_v32  ;;  %2291 = vrcp.f32 %v747_v19  ;;  %v1011_v48 = vmul.f32 %v2746_v17, %v979_v3  ;;  %v3085_v18 = vmul.f32 1.442695, %v1166_v49 }
 0x15c   : > { %2031 = vmatmul.mubr.f32.vlgmr.msra.gmra.mrb[32].mxu0 %v2869_v2  ;;  %v1393_v52 = vadd.f32 1.0, %v1361_v45  ;;  %2293 = vpow2.f32 %v1223_v63  ;;  %v1234_v15 = vmul.f32 %v2718_v29, %v1074_v62  ;;  %v884_v51 = vmul.f32 %v2740_v7, %v852_v33  ;;  %v3083_v61 = vpop.eup %2285 }
 0x15d   : > { %2295 = vrcp.f32 %v750_v39  ;;  %v1043_v1 = vadd.f32 0.2548296, %v1011_v48  ;;  %v821_v21 = vmul.f32 1.0614054, %v2781_v24  ;;  %vm1299_vm5 = vcmp.ge.f32.partialorder %v2609_v31, 0.0 }
 0x15e   : > { %v1425_v26 = vmul.f32 %v1393_v52, %v2645_v6  ;;  %v1266_v9 = vsub.f32 1.0, %v1234_v15  ;;  %v3091_v2 = vmul.f32 0.3275911, %v3070_v25  ;;  %v916_v12 = vadd.f32 1.4214138, %v884_v51 }
 0x15f   : > { %v1075_v29 = vmul.f32 %v2746_v17, %v1043_v1  ;;  %v853_v44 = vadd.f32 -1.4531521, %v821_v21  ;;  %v822_v19 = vmul.f32 1.0614054, %v2778_v37  ;;  %v823_v0 = vmul.f32 1.0614054, %v2824_v38 }
 0x160   : > { %2033 = vmatprep.mubr.f32.mxu0 %v1425_v26  ;;  %v1330_v63 = vsub.f32 0.0, %v1266_v9  ;;  %v948_v57 = vmul.f32 %v2740_v7, %v916_v12  ;;  %v3098_v39 = vmul.f32 0.5, %v2622_v46  ;;  %v824_v6 = vmul.f32 1.0614054, %v2808_v56  ;;  %v3103_v3 = vpop.eup %2287 }
 0x161   : > { %v1235_v5 = vmul.f32 %v2756_v11, %v1075_v29  ;;  %v885_v32 = vmul.f32 %v2781_v24, %v853_v44  ;;  %v854_v49 = vadd.f32 -1.4531521, %v822_v19  ;;  %v855_v17 = vadd.f32 -1.4531521, %v823_v0 }
 0x162   : > { %v1362_v62 = vsel %vm1298_vm4, %v1266_v9, %v1330_v63  ;;  %v980_v33 = vadd.f32 -0.28449672, %v948_v57  ;;  %v856_v45 = vadd.f32 -1.4531521, %v824_v6  ;;  %v825_v48 = vmul.f32 1.0614054, %v2858_v36 }
 0x163   : > { %v1394_v52 = vadd.f32 1.0, %v1362_v62  ;;  %v1267_v46 = vsub.f32 1.0, %v1235_v5  ;;  %v917_v15 = vadd.f32 1.4214138, %v885_v32  ;;  %v886_v51 = vmul.f32 %v2778_v37, %v854_v49  ;;  %v3109_v1 = vpop.eup %2289  ;;  %v3644_v9 = vld [vmem:[#allocation6_spill] sm:$0xff] }
 0x164   : > { %3643 = vst [vmem:[#allocation76_spill] sm:$0xff] %v3109_v1  ;;  %v1012_v11 = vmul.f32 %v2740_v7, %v980_v33  ;;  %v887_v21 = vmul.f32 %v2824_v38, %v855_v17  ;;  %v888_v26 = vmul.f32 %v2808_v56, %v856_v45  ;;  %v857_v12 = vadd.f32 -1.4531521, %v825_v48  ;;  %v3646_v17 = vld [vmem:[#allocation5_spill] sm:$0xff]  ;;  %v3647_v48 = vld [vmem:[#allocation34_spill] sm:$0xff] }
 0x165   : > { %v3114_v13 = vpop.eup %2291  ;;  %v1426_v29 = vmul.f32 %v1394_v52, %v3644_v9  ;;  %v1331_v44 = vsub.f32 0.0, %v1267_v46  ;;  %v949_v19 = vmul.f32 %v2781_v24, %v917_v15  ;;  %v918_v0 = vadd.f32 1.4214138, %v886_v51 }
 0x166   : > { %v3118_v63 = vpop.eup %2293  ;;  %v1044_v57 = vadd.f32 0.2548296, %v1012_v11  ;;  %v919_v6 = vadd.f32 1.4214138, %v887_v21  ;;  %v920_v5 = vadd.f32 1.4214138, %v888_v26  ;;  %v889_v32 = vmul.f32 %v2858_v36, %v857_v12 }
 0x167   : > { %3645 = vst [vmem:[#allocation6_spill] sm:$0xff] %v3118_v63  ;;  %v3121_v49 = vpop.eup %2295  ;;  %vm1300_vm6 = vcmp.ge.f32.partialorder %v3646_v17, 0.0  ;;  %2034 = vmatmul.mubr.f32.gmra.mrb[34].mxu0 %v1426_v29  ;;  %v1363_v62 = vsel %vm1299_vm5, %v1267_v46, %v1331_v44  ;;  %v981_v33 = vadd.f32 -0.28449672, %v949_v19  ;;  %v950_v45 = vmul.f32 %v2778_v37, %v918_v0  ;;  %v3649_v46 = vld [vmem:[#allocation20_spill] sm:$0xff] }
 0x168   : > { %v826_v52 = vmul.f32 1.0614054, %v3647_v48  ;;  %v1395_v15 = vadd.f32 1.0, %v1363_v62  ;;  %v1076_v51 = vmul.f32 %v2740_v7, %v1044_v57  ;;  %v951_v11 = vmul.f32 %v2824_v38, %v919_v6 }
 0x169   : > { %v952_v21 = vmul.f32 %v2808_v56, %v920_v5  ;;  %v1013_v26 = vmul.f32 %v2781_v24, %v981_v33  ;;  %v982_v12 = vadd.f32 -0.28449672, %v950_v45  ;;  %v921_v9 = vadd.f32 1.4214138, %v889_v32 }
 0x16a   : > { %v858_v29 = vadd.f32 -1.4531521, %v826_v52  ;;  %v1427_v31 = vmul.f32 %v1395_v15, %v3648_v34  ;;  %v1236_v44 = vmul.f32 %v3649_v46, %v1076_v51  ;;  %v983_v19 = vadd.f32 -0.28449672, %v951_v11  ;;  %v3650_v51 = vld [vmem:[#allocation7_spill] sm:$0xff] }
 0x16b   : > { %v984_v0 = vadd.f32 -0.28449672, %v952_v21  ;;  %v1045_v40 = vadd.f32 0.2548296, %v1013_v26  ;;  %v1014_v62 = vmul.f32 %v2778_v37, %v982_v12  ;;  %v953_v7 = vmul.f32 %v2858_v36, %v921_v9  ;;  %v3651_v21 = vld [vmem:[#allocation8_spill] sm:$0xff]  ;;  %v3652_v9 = vld [vmem:[#allocation9_spill] sm:$0xff] }
 0x16c   : > { %v890_v57 = vmul.f32 %v3647_v48, %v858_v29  ;;  %2036 = vmatprep.mubr.f32.mxu0 %v1427_v31  ;;  %v1268_v6 = vsub.f32 1.0, %v1236_v44  ;;  %v1015_v5 = vmul.f32 %v2824_v38, %v983_v19  ;;  %v827_v33 = vmul.f32 1.0614054, %v2898_v23  ;;  %v3653_v29 = vld [vmem:[#allocation11_spill] sm:$0xff]  ;;  %v3654_v31 = vld [vmem:[#allocation30_spill] sm:$0xff] }
 0x16d   : > { %v1016_v32 = vmul.f32 %v2808_v56, %v984_v0  ;;  %v1077_v34 = vmul.f32 %v2781_v24, %v1045_v40  ;;  %v1046_v45 = vadd.f32 0.2548296, %v1014_v62  ;;  %v985_v52 = vadd.f32 -0.28449672, %v953_v7 }
 0x16e   : > { %v922_v15 = vadd.f32 1.4214138, %v890_v57  ;;  %vm1302_vm7 = vcmp.ge.f32.partialorder %v3650_v51, 0.0  ;;  %v1332_v11 = vsub.f32 0.0, %v1268_v6  ;;  %vm1301_vm8 = vcmp.ge.f32.partialorder %v3651_v21, 0.0 }
 0x16f   : > { %v1047_v26 = vadd.f32 0.2548296, %v1015_v5  ;;  %v1048_v12 = vadd.f32 0.2548296, %v1016_v32  ;;  %vm1304_vm9 = vcmp.ge.f32.partialorder %v3652_v9, 0.0  ;;  %vm1303_vm10 = vcmp.ge.f32.partialorder %v3653_v29, 0.0 }
 0x170   : > { %v1237_v46 = vmul.f32 %v3654_v31, %v1077_v34  ;;  %v1078_v44 = vmul.f32 %v2778_v37, %v1046_v45  ;;  %v1017_v24 = vmul.f32 %v2858_v36, %v985_v52  ;;  %v954_v40 = vmul.f32 %v3647_v48, %v922_v15  ;;  %v3655_v32 = vld [vmem:[#allocation27_spill] sm:$0xff]  ;;  %v3662_v29 = vld [vmem:[#allocation22_spill] sm:$0xff] }
 0x171   : > { %v1364_v19 = vsel %vm1300_vm6, %v1268_v6, %v1332_v11  ;;  %v1079_v0 = vmul.f32 %v2824_v38, %v1047_v26  ;;  %v1080_v62 = vmul.f32 %v2808_v56, %v1048_v12  ;;  %v859_v7 = vadd.f32 -1.4531521, %v827_v33  ;;  %v3656_v34 = vld [vmem:[#allocation15_spill] sm:$0xff]  ;;  %v3658_v6 = vld [vmem:[#allocation10_spill] sm:$0xff] }
 0x172   : > { %v1396_v57 = vadd.f32 1.0, %v1364_v19  ;;  %v1269_v5 = vsub.f32 1.0, %v1237_v46  ;;  %v1238_v1 = vmul.f32 %v3655_v32, %v1078_v44  ;;  %v1049_v63 = vadd.f32 0.2548296, %v1017_v24  ;;  %v3657_v45 = vld [vmem:[#allocation31_spill] sm:$0xff] }
 0x173   : > { %vm1305_vm11 = vcmp.ge.f32.partialorder %v3656_v34, 0.0  ;;  %v1239_v37 = vmul.f32 %v2842_v42, %v1079_v0  ;;  %v1240_v52 = vmul.f32 %v3657_v45, %v1080_v62  ;;  %v986_v15 = vadd.f32 -0.28449672, %v954_v40  ;;  %v3659_v40 = vld [vmem:[#allocation40_spill] sm:$0xff] }
 0x174   : > { %v891_v17 = vmul.f32 %v2898_v23, %v859_v7  ;;  %v1428_v11 = vmul.f32 %v1396_v57, %v3658_v6  ;;  %v1333_v38 = vsub.f32 0.0, %v1269_v5  ;;  %v1270_v26 = vsub.f32 1.0, %v1238_v1  ;;  %v3661_v6 = vld [vmem:[#allocation14_spill] sm:$0xff] }
 0x175   : > { %v1081_v56 = vmul.f32 %v2858_v36, %v1049_v63  ;;  %v1271_v33 = vsub.f32 1.0, %v1239_v37  ;;  %v1272_v12 = vsub.f32 1.0, %v1240_v52  ;;  %v1018_v31 = vmul.f32 %v3647_v48, %v986_v15  ;;  %v3660_v37 = vld [vmem:[#allocation12_spill] sm:$0xff] }
 0x176   : > { %v923_v46 = vadd.f32 1.4214138, %v891_v17  ;;  %2037 = vmatmul.mubr.f32.gmra.mrb[36].mxu0 %v1428_v11  ;;  %v1365_v42 = vsel %vm1301_vm8, %v1269_v5, %v1333_v38  ;;  %v1334_v44 = vsub.f32 0.0, %v1270_v26  ;;  %v828_v19 = vmul.f32 1.0614054, %v3659_v40 }
 0x177   : > { %v1241_v24 = vmul.f32 %v2874_v54, %v1081_v56  ;;  %v1397_v0 = vadd.f32 1.0, %v1365_v42  ;;  %v1335_v62 = vsub.f32 0.0, %v1271_v33  ;;  %v1336_v7 = vsub.f32 0.0, %v1272_v12 }
 0x178   : > { %v1050_v1 = vadd.f32 0.2548296, %v1018_v31  ;;  %v1366_v36 = vsel %vm1302_vm7, %v1270_v26, %v1334_v44  ;;  %v955_v57 = vmul.f32 %v2898_v23, %v923_v46  ;;  %v860_v32 = vadd.f32 -1.4531521, %v828_v19 }
 0x179   : > { %v1273_v63 = vsub.f32 1.0, %v1241_v24  ;;  %vm1306_vm12 = vcmp.ge.f32.partialorder %v3660_v37, 0.0  ;;  %v1429_v21 = vmul.f32 %v1397_v0, %v3098_v39  ;;  %v1398_v5 = vadd.f32 1.0, %v1366_v36  ;;  %v3664_v24 = vld [vmem:[#allocation19_spill] sm:$0xff]  ;;  %v3666_v36 = vld [vmem:[#allocation24_spill] sm:$0xff] }
 0x17a   : > { %v1367_v54 = vsel %vm1303_vm10, %v1271_v33, %v1335_v62  ;;  %v1368_v45 = vsel %vm1304_vm9, %v1272_v12, %v1336_v7  ;;  %v1082_v51 = vmul.f32 %v3647_v48, %v1050_v1  ;;  %v987_v38 = vadd.f32 -0.28449672, %v955_v57  ;;  %v3663_v12 = vld [vmem:[#allocation36_spill] sm:$0xff]  ;;  %v3665_v62 = vld [vmem:[#allocation47_spill] sm:$0xff] }
 0x17b   : > { %v1399_v52 = vadd.f32 1.0, %v1367_v54  ;;  %v1400_v15 = vadd.f32 1.0, %v1368_v45  ;;  %v1337_v17 = vsub.f32 0.0, %v1273_v63  ;;  %2039 = vmatprep.mubr.f32.mxu1 %v1429_v21  ;;  %v1430_v11 = vmul.f32 %v1398_v5, %v3661_v6  ;;  %v3667_v21 = vld [vmem:[#allocation17_spill] sm:$0xff] }
 0x17c   : > { %v892_v26 = vmul.f32 %v3659_v40, %v860_v32  ;;  %v829_v39 = vmul.f32 1.0614054, %v2921_v47  ;;  %v1133_v56 = vsub.f32 0.0, %v3070_v25  ;;  %v1242_v31 = vmul.f32 %v3663_v12, %v1082_v51 }
 0x17d   : > { %v1431_v33 = vmul.f32 %v1399_v52, %v3662_v29  ;;  %v1369_v9 = vsel %vm1305_vm11, %v1273_v63, %v1337_v17  ;;  %2040 = vmatmul.mubr.f32.vlgmr.msra.gmra.mrb[0].mxu1 %v1430_v11  ;;  %v1019_v48 = vmul.f32 %v2898_v23, %v987_v38  ;;  %v1432_v19 = vmul.f32 %v1400_v15, %v3664_v24  ;;  %v3668_v29 = vld [vmem:[#allocation45_spill] sm:$0xff] }
 0x17e   : > { %v1401_v46 = vadd.f32 1.0, %v1369_v9  ;;  %v924_v42 = vadd.f32 1.4214138, %v892_v26  ;;  %v861_v44 = vadd.f32 -1.4531521, %v829_v39  ;;  %v1274_v0 = vsub.f32 1.0, %v1242_v31 }
 0x17f   : > { %2042 = vmatprep.mubr.f32.mxu1 %v1431_v33  ;;  %v830_v7 = vmul.f32 1.0614054, %v3665_v62  ;;  %v831_v1 = vmul.f32 1.0614054, %v2944_v41  ;;  %v1051_v34 = vadd.f32 0.2548296, %v1019_v48  ;;  %v3205_v12 = vmul.f32 %v1133_v56, %v3070_v25 }
 0x180   : > { %v1433_v57 = vmul.f32 %v1401_v46, %v3666_v36  ;;  %v956_v63 = vmul.f32 %v3659_v40, %v924_v42  ;;  %v893_v32 = vmul.f32 %v2921_v47, %v861_v44  ;;  %vm1307_vm13 = vcmp.ge.f32.partialorder %v3667_v21, 0.0  ;;  %v3669_v48 = vld [vmem:[#allocation23_spill] sm:$0xff] }
 0x181   : > { %v3192_v5 = vadd.f32 1.0, %v3091_v2  ;;  %v1338_v54 = vsub.f32 0.0, %v1274_v0  ;;  %v862_v45 = vadd.f32 -1.4531521, %v830_v7  ;;  %v863_v52 = vadd.f32 -1.4531521, %v831_v1  ;;  %2043 = vmatmul.mubr.f32.gmra.mrb[2].mxu1 %v1432_v19 }
 0x182   : > { %v1083_v15 = vmul.f32 %v2898_v23, %v1051_v34  ;;  %v988_v17 = vadd.f32 -0.28449672, %v956_v63  ;;  %v925_v51 = vadd.f32 1.4214138, %v893_v32  ;;  %v832_v6 = vmul.f32 1.0614054, %v2933_v16  ;;  %2045 = vmatprep.mubr.f32.mxu1 %v1433_v57 }
 0x183   : > { %v1370_v11 = vsel %vm1306_vm12, %v1274_v0, %v1338_v54  ;;  %v894_v38 = vmul.f32 %v3665_v62, %v862_v45  ;;  %v895_v26 = vmul.f32 %v2944_v41, %v863_v52  ;;  %v833_v2 = vmul.f32 1.0614054, %v2972_v55  ;;  %v3670_v0 = vld [vmem:[#allocation16_spill] sm:$0xff] }
 0x184   : > { %v1402_v39 = vadd.f32 1.0, %v1370_v11  ;;  %v1243_v33 = vmul.f32 %v3668_v29, %v1083_v15  ;;  %v1020_v9 = vmul.f32 %v3659_v40, %v988_v17  ;;  %v957_v23 = vmul.f32 %v2921_v47, %v925_v51  ;;  %v3671_v17 = vld [vmem:[#allocation42_spill] sm:$0xff] }
 0x185   : > { %v926_v31 = vadd.f32 1.4214138, %v894_v38  ;;  %v927_v46 = vadd.f32 1.4214138, %v895_v26  ;;  %v864_v37 = vadd.f32 -1.4531521, %v832_v6  ;;  %2297 = vrcp.f32 %v3192_v5 }
 0x186   : > { %v1434_v42 = vmul.f32 %v1402_v39, %v3669_v48  ;;  %v1275_v44 = vsub.f32 1.0, %v1243_v33  ;;  %v1052_v24 = vadd.f32 0.2548296, %v1020_v9  ;;  %v989_v19 = vadd.f32 -0.28449672, %v957_v23  ;;  %v3672_v38 = vld [vmem:[#allocation21_spill] sm:$0xff] }
 0x187   : > { %vm1308_vm14 = vcmp.ge.f32.partialorder %v3670_v0, 0.0  ;;  %v958_v7 = vmul.f32 %v3665_v62, %v926_v31  ;;  %v959_v1 = vmul.f32 %v2944_v41, %v927_v46  ;;  %v896_v36 = vmul.f32 %v2933_v16, %v864_v37  ;;  %v3673_v23 = vld [vmem:[#allocation29_spill] sm:$0xff] }
 0x188   : > { %v865_v57 = vadd.f32 -1.4531521, %v833_v2  ;;  %2046 = vmatmul.mubr.f32.gmra.mrb[4].mxu1 %v1434_v42  ;;  %v1339_v25 = vsub.f32 0.0, %v1275_v44  ;;  %v1084_v56 = vmul.f32 %v3659_v40, %v1052_v24  ;;  %v1021_v34 = vmul.f32 %v2921_v47, %v989_v19  ;;  %v3674_v42 = vld [vmem:[#allocation18_spill] sm:$0xff] }
 0x189   : > { %v834_v63 = vmul.f32 1.0614054, %v2964_v4  ;;  %v990_v32 = vadd.f32 -0.28449672, %v958_v7  ;;  %v991_v54 = vadd.f32 -0.28449672, %v959_v1  ;;  %2299 = vpow2.f32 %v3085_v18 }
 0x18a   : > { %v928_v45 = vadd.f32 1.4214138, %v896_v36  ;;  %v897_v52 = vmul.f32 %v2972_v55, %v865_v57  ;;  %v1371_v15 = vsel %vm1307_vm13, %v1275_v44, %v1339_v25  ;;  %v1244_v51 = vmul.f32 %v3671_v17, %v1084_v56  ;;  %v3675_v44 = vld [vmem:[#allocation26_spill] sm:$0xff] }
 0x18b   : > { %v1053_v6 = vadd.f32 0.2548296, %v1021_v34  ;;  %v866_v11 = vadd.f32 -1.4531521, %v834_v63  ;;  %vm1309_vm15 = vcmp.ge.f32.partialorder %v3672_v38, 0.0  ;;  %v1403_v26 = vadd.f32 1.0, %v1371_v15 }
 0x18c   : > { %v1022_v40 = vmul.f32 %v3665_v62, %v990_v32  ;;  %v1023_v2 = vmul.f32 %v2944_v41, %v991_v54  ;;  %v960_v39 = vmul.f32 %v2933_v16, %v928_v45  ;;  %v1276_v29 = vsub.f32 1.0, %v1244_v51  ;;  %v3676_v54 = vld [vmem:[#allocation48_spill] sm:$0xff] }
 0x18d   : > { %v1085_v33 = vmul.f32 %v2921_v47, %v1053_v6  ;;  %v929_v9 = vadd.f32 1.4214138, %v897_v52  ;;  %v898_v21 = vmul.f32 %v2964_v4, %v866_v11  ;;  %v1435_v31 = vmul.f32 %v1403_v26, %v3673_v23  ;;  %v3678_v11 = vld [vmem:[#allocation28_spill] sm:$0xff] }
 0x18e   : > { %v1054_v46 = vadd.f32 0.2548296, %v1022_v40  ;;  %v1055_v37 = vadd.f32 0.2548296, %v1023_v2  ;;  %v992_v48 = vadd.f32 -0.28449672, %v960_v39 }
 0x18f   : > { %vm1310_vm0 = vcmp.ge.f32.partialorder %v3674_v42, 0.0  ;;  %vm1311_vm1 = vcmp.ge.f32.partialorder %v3675_v44, 0.0  ;;  %v1340_v24 = vsub.f32 0.0, %v1276_v29  ;;  %v1245_v19 = vmul.f32 %v2924_v43, %v1085_v33  ;;  %2048 = vmatprep.mubr.f32.mxu1 %v1435_v31 }
 0x190   : > { %v961_v7 = vmul.f32 %v2972_v55, %v929_v9  ;;  %v930_v1 = vadd.f32 1.4214138, %v898_v21  ;;  %v1086_v47 = vmul.f32 %v3665_v62, %v1054_v46  ;;  %v1087_v36 = vmul.f32 %v2944_v41, %v1055_v37  ;;  %v3677_v62 = vld [vmem:[#allocation25_spill] sm:$0xff] }
 0x191   : > { %v1024_v57 = vmul.f32 %v2933_v16, %v992_v48  ;;  %v835_v25 = vmul.f32 1.0614054, %v3001_v8  ;;  %v1372_v56 = vsel %vm1308_vm14, %v1276_v29, %v1340_v24  ;;  %v1277_v34 = vsub.f32 1.0, %v1245_v19  ;;  %v3679_v9 = vld [vmem:[#allocation33_spill] sm:$0xff]  ;;  %v3681_v19 = vld [vmem:[#allocation32_spill] sm:$0xff] }
 0x192   : > { %v993_v63 = vadd.f32 -0.28449672, %v961_v7  ;;  %v962_v32 = vmul.f32 %v2964_v4, %v930_v1  ;;  %v1404_v43 = vadd.f32 1.0, %v1372_v56  ;;  %v1246_v45 = vmul.f32 %v3676_v54, %v1086_v47  ;;  %v3680_v46 = vld [vmem:[#allocation57_spill] sm:$0xff]  ;;  %v3682_v7 = vld [vmem:[#allocation39_spill] sm:$0xff] }
 0x193   : > { %v1247_v52 = vmul.f32 %v2957_v14, %v1087_v36  ;;  %v1056_v15 = vadd.f32 0.2548296, %v1024_v57  ;;  %vm1312_vm2 = vcmp.ge.f32.partialorder %v3677_v62, 0.0  ;;  %v1341_v41 = vsub.f32 0.0, %v1277_v34  ;;  %v3686_v62 = vld [vmem:[#allocation41_spill] sm:$0xff] }
 0x194   : > { %v1025_v17 = vmul.f32 %v2972_v55, %v993_v63  ;;  %v994_v51 = vadd.f32 -0.28449672, %v962_v32  ;;  %v867_v6 = vadd.f32 -1.4531521, %v835_v25  ;;  %v1436_v0 = vmul.f32 %v1404_v43, %v3678_v11 }
 0x195   : > { %v1278_v26 = vsub.f32 1.0, %v1246_v45  ;;  %v1279_v40 = vsub.f32 1.0, %v1247_v52  ;;  %v1088_v2 = vmul.f32 %v2933_v16, %v1056_v15  ;;  %v1373_v39 = vsel %vm1309_vm15, %v1277_v34, %v1341_v41  ;;  %v3683_v45 = vld [vmem:[#allocation35_spill] sm:$0xff]  ;;  %v3684_v52 = vld [vmem:[#allocation44_spill] sm:$0xff] }
 0x196   : > { %v1057_v29 = vadd.f32 0.2548296, %v1025_v17  ;;  %v1026_v14 = vmul.f32 %v2964_v4, %v994_v51  ;;  %v899_v33 = vmul.f32 %v3001_v8, %v867_v6  ;;  %vm1313_vm3 = vcmp.ge.f32.partialorder %v3679_v9, 0.0  ;;  %2049 = vmatmul.mubr.f32.gmra.mrb[6].mxu1 %v1436_v0  ;;  %v3685_v41 = vld [vmem:[#allocation63_spill] sm:$0xff]  ;;  %v3688_v9 = vld [vmem:[#allocation53_spill] sm:$0xff] }
 0x197   : > { %v1405_v21 = vadd.f32 1.0, %v1373_v39  ;;  %v1342_v23 = vsub.f32 0.0, %v1278_v26  ;;  %v1343_v31 = vsub.f32 0.0, %v1279_v40  ;;  %v1248_v37 = vmul.f32 %v3680_v46, %v1088_v2 }
 0x198   : > { %v1089_v48 = vmul.f32 %v2972_v55, %v1057_v29  ;;  %v1058_v24 = vadd.f32 0.2548296, %v1026_v14  ;;  %v931_v16 = vadd.f32 1.4214138, %v899_v33  ;;  %v836_v38 = vmul.f32 1.0614054, %v2990_v35 }
 0x199   : > { %vm1314_vm4 = vcmp.ge.f32.partialorder %v3681_v19, 0.0  ;;  %v1437_v1 = vmul.f32 %v1405_v21, %v3682_v7  ;;  %v1374_v47 = vsel %vm1310_vm0, %v1278_v26, %v1342_v23  ;;  %v1375_v36 = vsel %vm1311_vm1, %v1279_v40, %v1343_v31  ;;  %v3689_v19 = vld [vmem:[#allocation50_spill] sm:$0xff] }
 0x19a   : > { %v1280_v57 = vsub.f32 1.0, %v1248_v37  ;;  %v1406_v25 = vadd.f32 1.0, %v1374_v47  ;;  %v1407_v56 = vadd.f32 1.0, %v1375_v36  ;;  %v1249_v34 = vmul.f32 %v2985_v22, %v1089_v48 }
 0x19b   : > { %v1090_v55 = vmul.f32 %v2964_v4, %v1058_v24  ;;  %2051 = vmatprep.mubr.f32.mxu1 %v1437_v1  ;;  %v963_v32 = vmul.f32 %v3001_v8, %v931_v16  ;;  %v868_v43 = vadd.f32 -1.4531521, %v836_v38  ;;  %v837_v54 = vmul.f32 1.0614054, %v3027_v28  ;;  %v3687_v16 = vld [vmem:[#allocation38_spill] sm:$0xff] }
 0x19c   : > { %v1344_v63 = vsub.f32 0.0, %v1280_v57  ;;  %v1438_v42 = vmul.f32 %v1406_v25, %v3683_v45  ;;  %v1439_v15 = vmul.f32 %v1407_v56, %v3684_v52  ;;  %v1281_v44 = vsub.f32 1.0, %v1249_v34 }
 0x19d   : > { %v1250_v17 = vmul.f32 %v3685_v41, %v1090_v55  ;;  %v995_v22 = vadd.f32 -0.28449672, %v963_v32  ;;  %v900_v4 = vmul.f32 %v2990_v35, %v868_v43  ;;  %v869_v6 = vadd.f32 -1.4531521, %v837_v54 }
 0x19e   : > { %v1376_v51 = vsel %vm1312_vm2, %v1280_v57, %v1344_v63  ;;  %2052 = vmatmul.mubr.f32.gmra.mrb[8].mxu1 %v1438_v42  ;;  %v1345_v0 = vsub.f32 0.0, %v1281_v44  ;;  %v838_v40 = vmul.f32 1.0614054, %v3008_v60  ;;  %v839_v14 = vmul.f32 1.0614054, %v3049_v50 }
 0x19f   : > { %v1408_v11 = vadd.f32 1.0, %v1376_v51  ;;  %v1282_v26 = vsub.f32 1.0, %v1250_v17  ;;  %2054 = vmatprep.mubr.f32.mxu1 %v1439_v15  ;;  %v1027_v2 = vmul.f32 %v3001_v8, %v995_v22  ;;  %v932_v39 = vadd.f32 1.4214138, %v900_v4  ;;  %v3690_v22 = vld [vmem:[#allocation37_spill] sm:$0xff] }
 0x1a0   : > { %v901_v29 = vmul.f32 %v3027_v28, %v869_v6  ;;  %v1377_v21 = vsel %vm1313_vm3, %v1281_v44, %v1345_v0  ;;  %v870_v31 = vadd.f32 -1.4531521, %v838_v40  ;;  %vm1315_vm5 = vcmp.ge.f32.partialorder %v3687_v16, 0.0  ;;  %v3694_v16 = vld [vmem:[#allocation55_spill] sm:$0xff] }
 0x1a1   : > { %v1440_v33 = vmul.f32 %v1408_v11, %v3686_v62  ;;  %v1346_v23 = vsub.f32 0.0, %v1282_v26  ;;  %v1409_v46 = vadd.f32 1.0, %v1377_v21  ;;  %v1059_v37 = vadd.f32 0.2548296, %v1027_v2  ;;  %v3691_v62 = vld [vmem:[#allocation46_spill] sm:$0xff] }
 0x1a2   : > { %v964_v48 = vmul.f32 %v2990_v35, %v932_v39  ;;  %v933_v24 = vadd.f32 1.4214138, %v901_v29  ;;  %v902_v7 = vmul.f32 %v3008_v60, %v870_v31  ;;  %v871_v1 = vadd.f32 -1.4531521, %v839_v14  ;;  %v3692_v21 = vld [vmem:[#allocation66_spill] sm:$0xff] }
 0x1a3   : > { %2055 = vmatmul.mubr.f32.gmra.mrb[10].mxu1 %v1440_v33  ;;  %v1378_v38 = vsel %vm1314_vm4, %v1282_v26, %v1346_v23  ;;  %v840_v47 = vmul.f32 1.0614054, %v3036_v59  ;;  %v1441_v36 = vmul.f32 %v1409_v46, %v3688_v9  ;;  %v1091_v25 = vmul.f32 %v3001_v8, %v1059_v37 }
 0x1a4   : > { %v1410_v57 = vadd.f32 1.0, %v1378_v38  ;;  %v996_v56 = vadd.f32 -0.28449672, %v964_v48  ;;  %v965_v34 = vmul.f32 %v3027_v28, %v933_v24  ;;  %v934_v55 = vadd.f32 1.4214138, %v902_v7  ;;  %v3693_v38 = vld [vmem:[#allocation43_spill] sm:$0xff] }
 0x1a5   : > { %v903_v63 = vmul.f32 %v3049_v50, %v871_v1  ;;  %v872_v32 = vadd.f32 -1.4531521, %v840_v47  ;;  %2057 = vmatprep.mubr.f32.mxu1 %v1441_v36  ;;  %v1251_v54 = vmul.f32 %v3003_v30, %v1091_v25  ;;  %v841_v42 = vmul.f32 1.0614054, %v3072_v53 }
 0x1a6   : > { %v1442_v43 = vmul.f32 %v1410_v57, %v3689_v19  ;;  %v1028_v45 = vmul.f32 %v2990_v35, %v996_v56  ;;  %v997_v52 = vadd.f32 -0.28449672, %v965_v34  ;;  %v966_v15 = vmul.f32 %v3008_v60, %v934_v55  ;;  %v3695_v57 = vld [vmem:[#allocation71_spill] sm:$0xff] }
 0x1a7   : > { %v935_v8 = vadd.f32 1.4214138, %v903_v63  ;;  %v904_v44 = vmul.f32 %v3036_v59, %v872_v32  ;;  %v1283_v41 = vsub.f32 1.0, %v1251_v54  ;;  %v873_v51 = vadd.f32 -1.4531521, %v841_v42  ;;  %v3696_v55 = vld [vmem:[#allocation51_spill] sm:$0xff] }
 0x1a8   : > { %2058 = vmatmul.mubr.f32.gmra.mrb[12].mxu1 %v1442_v43  ;;  %v1060_v17 = vadd.f32 0.2548296, %v1028_v45  ;;  %vm1316_vm6 = vcmp.ge.f32.partialorder %v3690_v22, 0.0  ;;  %v1029_v30 = vmul.f32 %v3027_v28, %v997_v52  ;;  %v998_v4 = vadd.f32 -0.28449672, %v966_v15  ;;  %v3697_v54 = vld [vmem:[#allocation69_spill] sm:$0xff]  ;;  %v3316_v15 = vpop.eup %2297 }
 0x1a9   : > { %v967_v6 = vmul.f32 %v3049_v50, %v935_v8  ;;  %v936_v11 = vadd.f32 1.4214138, %v904_v44  ;;  %v1347_v0 = vsub.f32 0.0, %v1283_v41  ;;  %v905_v40 = vmul.f32 %v3072_v53, %v873_v51  ;;  %v3700_v22 = vld [vmem:[#allocation54_spill] sm:$0xff] }
 0x1aa   : > { %v1092_v26 = vmul.f32 %v2990_v35, %v1060_v17  ;;  %v842_v2 = vmul.f32 1.0614054, %v3061_v20  ;;  %v1061_v5 = vadd.f32 0.2548296, %v1029_v30  ;;  %v1030_v39 = vmul.f32 %v3008_v60, %v998_v4  ;;  %v3698_v17 = vld [vmem:[#allocation49_spill] sm:$0xff] }
 0x1ab   : > { %v999_v29 = vadd.f32 -0.28449672, %v967_v6  ;;  %v968_v14 = vmul.f32 %v3036_v59, %v936_v11  ;;  %vm1317_vm7 = vcmp.ge.f32.partialorder %v3691_v62, 0.0  ;;  %v1379_v33 = vsel %vm1315_vm5, %v1283_v41, %v1347_v0  ;;  %v3702_v62 = vld [vmem:[#allocation60_spill] sm:$0xff] }
 0x1ac   : > { %v1252_v23 = vmul.f32 %v3692_v21, %v1092_v26  ;;  %v937_v31 = vadd.f32 1.4214138, %v905_v40  ;;  %v874_v46 = vadd.f32 -1.4531521, %v842_v2  ;;  %v1411_v35 = vadd.f32 1.0, %v1379_v33  ;;  %v3699_v40 = vld [vmem:[#allocation61_spill] sm:$0xff] }
 0x1ad   : > { %v1093_v37 = vmul.f32 %v3027_v28, %v1061_v5  ;;  %v1062_v48 = vadd.f32 0.2548296, %v1030_v39  ;;  %v1031_v24 = vmul.f32 %v3049_v50, %v999_v29  ;;  %vm1318_vm8 = vcmp.ge.f32.partialorder %v3693_v38, 0.0  ;;  %v3701_v33 = vld [vmem:[#allocation73_spill] sm:$0xff]  ;;  %v3703_v38 = vld [vmem:[#allocation59_spill] sm:$0xff] }
 0x1ae   : > { %v1284_v7 = vsub.f32 1.0, %v1252_v23  ;;  %v1000_v1 = vadd.f32 -0.28449672, %v968_v14  ;;  %v969_v47 = vmul.f32 %v3072_v53, %v937_v31  ;;  %v906_v9 = vmul.f32 %v3061_v20, %v874_v46 }
 0x1af   : > { %v1443_v36 = vmul.f32 %v1411_v35, %v3694_v16  ;;  %v1253_v25 = vmul.f32 %v3695_v57, %v1093_v37  ;;  %v1094_v56 = vmul.f32 %v3008_v60, %v1062_v48  ;;  %v1063_v34 = vadd.f32 0.2548296, %v1031_v24 }
 0x1b0   : > { %vm1319_vm9 = vcmp.ge.f32.partialorder %v3696_v55, 0.0  ;;  %v1348_v28 = vsub.f32 0.0, %v1284_v7  ;;  %v1032_v63 = vmul.f32 %v3036_v59, %v1000_v1  ;;  %v1001_v32 = vadd.f32 -0.28449672, %v969_v47  ;;  %v3704_v55 = vld [vmem:[#allocation68_spill] sm:$0xff] }
 0x1b1   : > { %v938_v19 = vadd.f32 1.4214138, %v906_v9  ;;  %2060 = vmatprep.mubr.f32.mxu1 %v1443_v36  ;;  %v1285_v43 = vsub.f32 1.0, %v1253_v25  ;;  %v1254_v45 = vmul.f32 %v3697_v54, %v1094_v56  ;;  %v1095_v42 = vmul.f32 %v3049_v50, %v1063_v34 }
 0x1b2   : > { %v843_v52 = vmul.f32 1.0614054, %v3114_v13  ;;  %v1380_v60 = vsel %vm1316_vm6, %v1284_v7, %v1348_v28  ;;  %v1064_v8 = vadd.f32 0.2548296, %v1032_v63  ;;  %v1033_v44 = vmul.f32 %v3072_v53, %v1001_v32 }
 0x1b3   : > { %v970_v41 = vmul.f32 %v3061_v20, %v938_v19  ;;  %vm1320_vm10 = vcmp.ge.f32.partialorder %v3698_v17, 0.0  ;;  %v1412_v51 = vadd.f32 1.0, %v1380_v60  ;;  %v1349_v30 = vsub.f32 0.0, %v1285_v43 }
 0x1b4   : > { %v1286_v4 = vsub.f32 1.0, %v1254_v45  ;;  %v1255_v6 = vmul.f32 %v3052_v58, %v1095_v42  ;;  %v1096_v50 = vmul.f32 %v3036_v59, %v1064_v8  ;;  %v1065_v11 = vadd.f32 0.2548296, %v1033_v44 }
 0x1b5   : > { %v1002_v0 = vadd.f32 -0.28449672, %v970_v41  ;;  %v875_v26 = vadd.f32 -1.4531521, %v843_v52  ;;  %vm1321_vm11 = vcmp.ge.f32.partialorder %v3699_v40, 0.0  ;;  %v1444_v2 = vmul.f32 %v1412_v51, %v3700_v22  ;;  %v3705_v41 = vld [vmem:[#allocation64_spill] sm:$0xff] }
 0x1b6   : > { %v1381_v5 = vsel %vm1317_vm7, %v1285_v43, %v1349_v30  ;;  %v1350_v39 = vsub.f32 0.0, %v1286_v4  ;;  %v1287_v29 = vsub.f32 1.0, %v1255_v6  ;;  %v1256_v21 = vmul.f32 %v3701_v33, %v1096_v50 }
 0x1b7   : > { %v1413_v14 = vadd.f32 1.0, %v1381_v5  ;;  %v1097_v23 = vmul.f32 %v3072_v53, %v1065_v11  ;;  %v1034_v58 = vmul.f32 %v3061_v20, %v1002_v0  ;;  %2061 = vmatmul.mubr.f32.gmra.mrb[14].mxu1 %v1444_v2  ;;  %v907_v46 = vmul.f32 %v3114_v13, %v875_v26  ;;  %v3706_v11 = vld [vmem:[#allocation56_spill] sm:$0xff] }
 0x1b8   : > { %v1382_v59 = vsel %vm1318_vm8, %v1286_v4, %v1350_v39  ;;  %v1351_v31 = vsub.f32 0.0, %v1287_v29  ;;  %v844_v35 = vmul.f32 1.0614054, %v3083_v61  ;;  %v1288_v24 = vsub.f32 1.0, %v1256_v21  ;;  %v3707_v5 = vld [vmem:[#allocation52_spill] sm:$0xff] }
 0x1b9   : > { %v1445_v37 = vmul.f32 %v1413_v14, %v3702_v62  ;;  %v1414_v48 = vadd.f32 1.0, %v1382_v59  ;;  %v1257_v7 = vmul.f32 %v3103_v3, %v1097_v23  ;;  %v1066_v1 = vadd.f32 0.2548296, %v1034_v58  ;;  %v3708_v58 = vld [vmem:[#allocation6_spill] sm:$0xff] }
 0x1ba   : > { %v1383_v53 = vsel %vm1319_vm9, %v1287_v29, %v1351_v31  ;;  %v939_v47 = vadd.f32 1.4214138, %v907_v46  ;;  %v876_v9 = vadd.f32 -1.4531521, %v844_v35  ;;  %v1352_v57 = vsub.f32 0.0, %v1288_v24 }
 0x1bb   : > { %2063 = vmatprep.mubr.f32.mxu1 %v1445_v37  ;;  %v1446_v16 = vmul.f32 %v1414_v48, %v3703_v38  ;;  %v1415_v36 = vadd.f32 1.0, %v1383_v53  ;;  %v1289_v25 = vsub.f32 1.0, %v1257_v7  ;;  %v1098_v56 = vmul.f32 %v3061_v20, %v1066_v1  ;;  %v3709_v7 = vld [vmem:[#allocation67_spill] sm:$0xff]  ;;  %v3710_v53 = vld [vmem:[#allocation76_spill] sm:$0xff]  ;;  %v3711_v38 = vld [vmem:[#allocation65_spill] sm:$0xff] }
 0x1bc   : > { %v971_v34 = vmul.f32 %v3114_v13, %v939_v47  ;;  %v908_v28 = vmul.f32 %v3083_v61, %v876_v9  ;;  %v845_v3 = vmul.f32 1.0614054, %v3316_v15  ;;  %v1384_v32 = vsel %vm1320_vm10, %v1288_v24, %v1352_v57  ;;  %v2300_v57 = vpop.eup %2299 }
 0x1bd   : > { %2064 = vmatmul.mubr.f32.gmra.mrb[16].mxu1 %v1446_v16  ;;  %v1447_v63 = vmul.f32 %v1415_v36, %v3704_v55  ;;  %v1353_v19 = vsub.f32 0.0, %v1289_v25  ;;  %v846_v43 = vmul.f32 1.0614054, %v3121_v49  ;;  %v1416_v54 = vadd.f32 1.0, %v1384_v32 }
 0x1be   : > { %v1258_v45 = vmul.f32 %v3064_v10, %v1098_v56  ;;  %v1003_v42 = vadd.f32 -0.28449672, %v971_v34  ;;  %v940_v20 = vadd.f32 1.4214138, %v908_v28  ;;  %v1227_v52 = vmul.f32 1.442695, %v3205_v12 }
 0x1bf   : > { %2066 = vmatprep.mubr.f32.mxu1 %v1447_v63  ;;  %v1385_v60 = vsel %vm1321_vm11, %v1289_v25, %v1353_v19  ;;  %v877_v8 = vadd.f32 -1.4531521, %v845_v3  ;;  %v878_v44 = vadd.f32 -1.4531521, %v846_v43  ;;  %v1448_v51 = vmul.f32 %v1416_v54, %v3705_v41  ;;  %v3712_v19 = vld [vmem:[#allocation62_spill] sm:$0xff] }
 0x1c0   : > { %v1417_v17 = vadd.f32 1.0, %v1385_v60  ;;  %v1290_v30 = vsub.f32 1.0, %v1258_v45  ;;  %v1035_v4 = vmul.f32 %v3114_v13, %v1003_v42  ;;  %v972_v6 = vmul.f32 %v3083_v61, %v940_v20  ;;  %v3713_v42 = vld [vmem:[#allocation58_spill] sm:$0xff] }
 0x1c1   : > { %v909_v10 = vmul.f32 %v3316_v15, %v877_v8  ;;  %v910_v50 = vmul.f32 %v3121_v49, %v878_v44  ;;  %vm1322_vm12 = vcmp.ge.f32.partialorder %v3706_v11, 0.0  ;;  %2067 = vmatmul.mubr.f32.gmra.mrb[18].mxu1 %v1448_v51  ;;  %v618_v39 = vmul.f32 0.5, %v3707_v5 }
 0x1c2   : > { %v1449_v12 = vmul.f32 %v1417_v17, %v3075_v27  ;;  %v1354_v0 = vsub.f32 0.0, %v1290_v30  ;;  %v1067_v26 = vadd.f32 0.2548296, %v1035_v4  ;;  %v1004_v40 = vadd.f32 -0.28449672, %v972_v6  ;;  %v3716_v17 = vld [vmem:[#allocation74_spill] sm:$0xff] }
 0x1c3   : > { %v941_v22 = vadd.f32 1.4214138, %v909_v10  ;;  %v942_v2 = vadd.f32 1.4214138, %v910_v50  ;;  %2301 = vpow2.f32 %v1227_v52  ;;  %vm1323_vm13 = vcmp.ge.f32.partialorder %v3709_v7, 0.0  ;;  %v3717_v10 = vld [vmem:[#allocation70_spill] sm:$0xff] }
 0x1c4   : > { %2069 = vmatprep.mubr.f32.mxu1 %v1449_v12  ;;  %v1386_v29 = vsel %vm1322_vm12, %v1290_v30, %v1354_v0  ;;  %v1099_v14 = vmul.f32 %v3114_v13, %v1067_v26  ;;  %v1036_v21 = vmul.f32 %v3083_v61, %v1004_v40  ;;  %v619_v16 = vmul.f32 0.5, %v3711_v38  ;;  %v3387_v0 = vld [vmem:[%s3511_s4] ss:$0 sm:$0xff] }
 0x1c5   : > { %v1418_v33 = vadd.f32 1.0, %v1386_v29  ;;  %v973_v23 = vmul.f32 %v3316_v15, %v941_v22  ;;  %v974_v27 = vmul.f32 %v3121_v49, %v942_v2  ;;  %vm1324_vm14 = vcmp.ge.f32.partialorder %v3712_v19, 0.0 }
 0x1c6   : > { %v1259_v59 = vmul.f32 %v3708_v58, %v1099_v14  ;;  %v1068_v31 = vadd.f32 0.2548296, %v1036_v21  ;;  %v620_v20 = vmul.f32 0.5, %v3713_v42  ;;  %v621_v30 = vmul.f32 0.5, %v3716_v17 }
 0x1c7   : > { %v1450_v18 = vmul.f32 %v1418_v33, %v618_v39  ;;  %v1005_v46 = vadd.f32 -0.28449672, %v973_v23  ;;  %v1006_v35 = vadd.f32 -0.28449672, %v974_v27  ;;  %v622_v50 = vmul.f32 0.5, %v3717_v10 }
 0x1c8   : > { %v1291_v62 = vsub.f32 1.0, %v1259_v59  ;;  %v1100_v37 = vmul.f32 %v3083_v61, %v1068_v31 }
 0x1c9   : > { %2070 = vmatmul.mubr.f32.gmra.mrb[20].mxu1 %v1450_v18  ;;  %v1037_v48 = vmul.f32 %v3316_v15, %v1005_v46  ;;  %v1038_v13 = vmul.f32 %v3121_v49, %v1006_v35 }
 0x1ca   : > { %v1355_v24 = vsub.f32 0.0, %v1291_v62  ;;  %v1260_v1 = vmul.f32 %v3710_v53, %v1100_v37 }
 0x1cb   : > { %v1069_v47 = vadd.f32 0.2548296, %v1037_v48  ;;  %v1070_v9 = vadd.f32 0.2548296, %v1038_v13 }
 0x1cc   : > { %v1387_v36 = vsel %vm1323_vm13, %v1291_v62, %v1355_v24  ;;  %v1292_v56 = vsub.f32 1.0, %v1260_v1 }
 0x1cd   : > { %v1419_v25 = vadd.f32 1.0, %v1387_v36  ;;  %v1101_v34 = vmul.f32 %v3316_v15, %v1069_v47  ;;  %v1102_v61 = vmul.f32 %v3121_v49, %v1070_v9  ;;  %v2302_v28 = vpop.eup %2301  ;;  %v3714_v15 = vld [vmem:[#allocation72_spill] sm:$0xff]  ;;  %v3715_v49 = vld [vmem:[#allocation75_spill] sm:$0xff] }
 0x1ce   : > { %v1356_v55 = vsub.f32 0.0, %v1292_v56  ;;  %vm1326_vm15 = vcmp.ge.f32.partialorder %v3714_v15, 0.0  ;;  %vm1325_vm0 = vcmp.ge.f32.partialorder %v3715_v49, 0.0 }
 0x1cf   : > { %v1451_v3 = vmul.f32 %v1419_v25, %v619_v16  ;;  %v1261_v63 = vmul.f32 %v2302_v28, %v1101_v34  ;;  %v1262_v32 = vmul.f32 %v2300_v57, %v1102_v61 }
 0x1d0   : > { %v1388_v43 = vsel %vm1324_vm14, %v1292_v56, %v1356_v55 }
 0x1d1   : > { %2072 = vmatprep.mubr.f32.mxu1 %v1451_v3  ;;  %v1293_v54 = vsub.f32 1.0, %v1261_v63  ;;  %v1294_v45 = vsub.f32 1.0, %v1262_v32  ;;  %v1420_v52 = vadd.f32 1.0, %v1388_v43 }
 0x1d3   : > { %v1357_v60 = vsub.f32 0.0, %v1293_v54  ;;  %v1358_v8 = vsub.f32 0.0, %v1294_v45  ;;  %v1452_v44 = vmul.f32 %v1420_v52, %v620_v20 }
 0x1d5   : > { %v1389_v41 = vsel %vm1325_vm0, %v1293_v54, %v1357_v60  ;;  %v1390_v51 = vsel %vm1326_vm15, %v1294_v45, %v1358_v8  ;;  %2073 = vmatmul.mubr.f32.gmra.mrb[22].mxu1 %v1452_v44 }
 0x1d6   : > { %v1421_v4 = vadd.f32 1.0, %v1389_v41  ;;  %v1422_v6 = vadd.f32 1.0, %v1390_v51 }
 0x1d8   : > { %v1453_v11 = vmul.f32 %v1421_v4, %v621_v30  ;;  %v1454_v12 = vmul.f32 %v1422_v6, %v622_v50 }
 0x1da   : > { %2075 = vmatprep.mubr.f32.mxu1 %v1453_v11 }
 0x1db   : > { %2076 = vmatmul.mubr.f32.gmra.mrb[24].mxu1 %v1454_v12 }
 0x22f   : > { %v2032_v26 = vpop.f32.mrb[32].mxu0 }
 0x230   : > { %v1550_v40 = vadd.f32 %v2032_v26, %v3387_v0  ;;  %v1544_v22 = vpop.f32.mrb[33].mxu0 }
 0x231   : > { %v1545_v2 = vadd.f32 %v3387_v0, %v1544_v22 }
 0x232   : > { %1704 = vst [vmem:[%s3391_s8 + $0x8] sm:$0xff] %v1550_v40 }
 0x233   : > { %1703 = vst [vmem:[%s3391_s8] sm:$0xff] %v1545_v2 }
 0x23a   : > { %v2035_v5 = vpop.f32.mrb[34].mxu0 }
 0x23b   : > { %v1560_v39 = vadd.f32 %v2035_v5, %v3387_v0  ;;  %v1554_v29 = vpop.f32.mrb[35].mxu0 }
 0x23c   : > { %v1555_v14 = vadd.f32 %v3387_v0, %v1554_v29 }
 0x23d   : > { %1706 = vst [vmem:[%s3391_s8 + $0x18] sm:$0xff] %v1560_v39 }
 0x23e   : > { %1705 = vst [vmem:[%s3391_s8 + $0x10] sm:$0xff] %v1555_v14 }
 0x249   : > { %v2038_v33 = vpop.f32.mrb[36].mxu0 }
 0x24a   : > { %v1570_v21 = vadd.f32 %v2038_v33, %v3387_v0  ;;  %v1564_v23 = vpop.f32.mrb[37].mxu0 }
 0x24b   : > { %v1565_v27 = vadd.f32 %v3387_v0, %v1564_v23 }
 0x24c   : > { %1708 = vst [vmem:[%s3391_s8 + $0x28] sm:$0xff] %v1570_v21 }
 0x24d   : > { %1707 = vst [vmem:[%s3391_s8 + $0x20] sm:$0xff] %v1565_v27 }
 0x250   : > { %v2041_v58 = vpop.f32.mrb[0].mxu1 }
 0x251   : > { %v1580_v59 = vadd.f32 %v2041_v58, %v3387_v0  ;;  %v1574_v18 = vpop.f32.mrb[1].mxu1 }
 0x252   : > { %v1575_v31 = vadd.f32 %v3387_v0, %v1574_v18 }
 0x253   : > { %1710 = vst [vmem:[%s3391_s8 + $0x38] sm:$0xff] %v1580_v59 }
 0x254   : > { %1709 = vst [vmem:[%s3391_s8 + $0x30] sm:$0xff] %v1575_v31  ;;  %v2044_v46 = vpop.f32.mrb[2].mxu1 }
 0x255   : > { %v1590_v35 = vadd.f32 %v2044_v46, %v3387_v0  ;;  %v1584_v62 = vpop.f32.mrb[3].mxu1 }
 0x256   : > { %v1585_v37 = vadd.f32 %v3387_v0, %v1584_v62 }
 0x257   : > { %1712 = vst [vmem:[%s3391_s8 + $0x48] sm:$0xff] %v1590_v35 }
 0x258   : > { %1711 = vst [vmem:[%s3391_s8 + $0x40] sm:$0xff] %v1585_v37 }
 0x25b   : > { %v2047_v48 = vpop.f32.mrb[4].mxu1 }
 0x25c   : > { %v1600_v13 = vadd.f32 %v2047_v48, %v3387_v0  ;;  %v1594_v24 = vpop.f32.mrb[5].mxu1 }
 0x25d   : > { %v1595_v7 = vadd.f32 %v3387_v0, %v1594_v24 }
 0x25e   : > { %1714 = vst [vmem:[%s3391_s8 + $0x58] sm:$0xff] %v1600_v13 }
 0x25f   : > { %1713 = vst [vmem:[%s3391_s8 + $0x50] sm:$0xff] %v1595_v7 }
 0x269   : > { %v2050_v53 = vpop.f32.mrb[6].mxu1 }
 0x26a   : > { %v1610_v1 = vadd.f32 %v2050_v53, %v3387_v0  ;;  %v1604_v47 = vpop.f32.mrb[7].mxu1 }
 0x26b   : > { %v1605_v9 = vadd.f32 %v3387_v0, %v1604_v47 }
 0x26c   : > { %1716 = vst [vmem:[%s3391_s8 + $0x68] sm:$0xff] %v1610_v1 }
 0x26d   : > { %1715 = vst [vmem:[%s3391_s8 + $0x60] sm:$0xff] %v1605_v9 }
 0x271   : > { %v2053_v38 = vpop.f32.mrb[8].mxu1 }
 0x272   : > { %v1620_v16 = vadd.f32 %v2053_v38, %v3387_v0  ;;  %v1614_v36 = vpop.f32.mrb[9].mxu1 }
 0x273   : > { %v1615_v57 = vadd.f32 %v3387_v0, %v1614_v36 }
 0x274   : > { %1718 = vst [vmem:[%s3391_s8 + $0x78] sm:$0xff] %v1620_v16 }
 0x275   : > { %1717 = vst [vmem:[%s3391_s8 + $0x70] sm:$0xff] %v1615_v57 }
 0x276   : > { %v2056_v25 = vpop.f32.mrb[10].mxu1 }
 0x277   : > { %v1630_v56 = vadd.f32 %v2056_v25, %v3387_v0  ;;  %v1624_v34 = vpop.f32.mrb[11].mxu1 }
 0x278   : > { %v1625_v61 = vadd.f32 %v3387_v0, %v1624_v34 }
 0x279   : > { %1720 = vst [vmem:[%s3391_s8 + $0x88] sm:$0xff] %v1630_v56 }
 0x27a   : > { %1719 = vst [vmem:[%s3391_s8 + $0x80] sm:$0xff] %v1625_v61 }
 0x27b   : > { %v2059_v28 = vpop.f32.mrb[12].mxu1 }
 0x27c   : > { %v1640_v3 = vadd.f32 %v2059_v28, %v3387_v0  ;;  %v1634_v55 = vpop.f32.mrb[13].mxu1 }
 0x27d   : > { %v1635_v63 = vadd.f32 %v3387_v0, %v1634_v55 }
 0x27e   : > { %1722 = vst [vmem:[%s3391_s8 + $0x98] sm:$0xff] %v1640_v3 }
 0x27f   : > { %1721 = vst [vmem:[%s3391_s8 + $0x90] sm:$0xff] %v1635_v63 }
 0x28a   : > { %v2062_v32 = vpop.f32.mrb[14].mxu1 }
 0x28b   : > { %v1650_v19 = vadd.f32 %v2062_v32, %v3387_v0  ;;  %v1644_v43 = vpop.f32.mrb[15].mxu1 }
 0x28c   : > { %v1645_v54 = vadd.f32 %v3387_v0, %v1644_v43 }
 0x28d   : > { %1724 = vst [vmem:[%s3391_s8 + $0xa8] sm:$0xff] %v1650_v19 }
 0x28e   : > { %1723 = vst [vmem:[%s3391_s8 + $0xa0] sm:$0xff] %v1645_v54 }
 0x290   : > { %v2065_v45 = vpop.f32.mrb[16].mxu1 }
 0x291   : > { %v1660_v42 = vadd.f32 %v2065_v45, %v3387_v0  ;;  %v1654_v20 = vpop.f32.mrb[17].mxu1 }
 0x292   : > { %v1655_v52 = vadd.f32 %v3387_v0, %v1654_v20 }
 0x293   : > { %1726 = vst [vmem:[%s3391_s8 + $0xb8] sm:$0xff] %v1660_v42 }
 0x294   : > { %1725 = vst [vmem:[%s3391_s8 + $0xb0] sm:$0xff] %v1655_v52  ;;  %v2068_v60 = vpop.f32.mrb[18].mxu1 }
 0x295   : > { %v1670_v8 = vadd.f32 %v2068_v60, %v3387_v0  ;;  %v1664_v15 = vpop.f32.mrb[19].mxu1 }
 0x296   : > { %v1665_v49 = vadd.f32 %v3387_v0, %v1664_v15 }
 0x297   : > { %1728 = vst [vmem:[%s3391_s8 + $0xc8] sm:$0xff] %v1670_v8 }
 0x298   : > { %1727 = vst [vmem:[%s3391_s8 + $0xc0] sm:$0xff] %v1665_v49 }
 0x29c   : > { %v2071_v44 = vpop.f32.mrb[20].mxu1 }
 0x29d   : > { %v1680_v41 = vadd.f32 %v2071_v44, %v3387_v0  ;;  %v1674_v51 = vpop.f32.mrb[21].mxu1 }
 0x29e   : > { %v1675_v17 = vadd.f32 %v3387_v0, %v1674_v51 }
 0x29f   : > { %1730 = vst [vmem:[%s3391_s8 + $0xd8] sm:$0xff] %v1680_v41 }
 0x2a0   : > { %1729 = vst [vmem:[%s3391_s8 + $0xd0] sm:$0xff] %v1675_v17 }
 0x2a8   : > { %v2074_v30 = vpop.f32.mrb[22].mxu1 }
 0x2a9   : > { %v1690_v4 = vadd.f32 %v2074_v30, %v3387_v0  ;;  %v1684_v6 = vpop.f32.mrb[23].mxu1 }
 0x2aa   : > { %v1685_v10 = vadd.f32 %v3387_v0, %v1684_v6 }
 0x2ab   : > { %1732 = vst [vmem:[%s3391_s8 + $0xe8] sm:$0xff] %v1690_v4 }
 0x2ac   : > { %1731 = vst [vmem:[%s3391_s8 + $0xe0] sm:$0xff] %v1685_v10 }
 0x2ae   : > { %v2077_v50 = vpop.f32.mrb[24].mxu1 }
 0x2af   : > { %v1700_v11 = vadd.f32 %v2077_v50, %v3387_v0  ;;  %v1694_v12 = vpop.f32.mrb[25].mxu1 }
 0x2b0   : > { %v1695_v26 = vadd.f32 %v3387_v0, %v1694_v12 }
 0x2b1   : > { %1734 = vst [vmem:[%s3391_s8 + $0xf8] sm:$0xff] %v1700_v11 }
 0x2b2   : > { %1733 = vst [vmem:[%s3391_s8 + $0xf0] sm:$0xff] %v1695_v26 }
 0x2b3   : > { %2316 = shalt.err (!%p2313_p3)
}
 0x2b4   : > { %s2317_s23 = scalar_lea.hbm %s3457_s13, 4096  ;;  %s2321_s30 = scalar_lea.hbm %s3512_s5, 8192 }
 0x2b5   : > { %p2318_p4 = scmp.ne.s32.totalorder %s3457_s13, %s2317_s23  ;;  %p2322_p9 = scmp.lt.u32.totalorder %s3457_s13, %s3512_s5 }
 0x2b6   : > { %p2323_p10 = scmp.lt.u32.totalorder %s2321_s30, %s2317_s23  ;;  %p2325_p12 = scmp.lt.u32.totalorder %s2317_s23, %s3457_s13 }
 0x2b7   : > { %p2319_p7 = pnand %p2318_p4, %p2438_p5 }
 0x2b8   : > { %p2324_p11 = por %p2323_p10, %p2322_p9 }
 0x2b9   : > { %p2320_p8 = pneg %p2319_p7 }
 0x2ba   : > { %p2326_p13 = por %p2325_p12, %p2324_p11 }
 0x2bc   : > { %p2327_p0 = pnand %p2326_p13, %p2320_p8 }
 0x2be   : > { %2330 = shalt.err (!%p2327_p0)
}
 0x2bf   : > { %s2368_s8 = smov 128   ;;  %s2369_s9 = smov 8  }
 0x2c0   : > { %2134 = dma.vmem_to_hbm [thread:$0]  (%p2438_p5), %s3459_s10, 4096, %s3457_s13, %s3466_s22, %s2368_s8, %s2368_s8, %s2369_s9  }
 0x2c1 PF: > { %p2140_p1 = scmp.ge.s32.totalorder %s2365_s21, 2  ;;  %s1764_s11 = sand.u32 1, %s2353_s18  }
 0x2c2   : > { %s1765_s12 = scalar_lea.sflag [#allocation3], %s1764_s11 }
 0x2c3   : > { %p2137_p2 = pnand %p2140_p1, %p2442_p6 }
 0x2c5   : > { %2348 = dma.done.wait (!%p2137_p2), %s1765_s12, 4096  }
 0x2c6   : > { %2350 = vsyncadd (!%p2137_p2), %s1765_s12, 4294963200  ;;  %p15_p3 = scmp.ge.s32.totalorder %s2425_s24, 4   ;;  %s3718_s18 = smov %s2357_s19 }
 0x2c7   : > { %s3719_s19 = smov %s2361_s20  ;;  %s3720_s20 = smov %s2436_s27 }
 0x2c8   : > { %s3721_s21 = smov %s2425_s24  ;;  %17 = sbr.rel (!%p15_p3) target bundleno = 3 (0x3), region = 75 }
 0x2cf   :  { %1770 = vsyncpa [#allocation3], 1 }
 0x2d0   :  { %1772 = vsyncpa [#allocation3 + $0x1], 1 }

</bundles_post_ra>
